<compile_context>
chip_gen: v6e
topology: v6e:2x2x1
jax: 0.10.0
libtpu: 0.0.40
codegen_flags: <defaults>
</compile_context>

<pallas_src>
import jax
import jax.numpy as jnp
import numpy as np
from jax.experimental import pallas as pl
from jax.experimental.pallas import tpu as pltpu

D_MODEL = 32          # config.d_model
N_HEADS = 4           # config.encoder_attention_heads
FF_DIM = 64           # config.encoder_ff_dim
HEAD_DIM = D_MODEL // N_HEADS
LN_EPS = 1e-5

# bf16 MXU operands with f32 accumulation (review item).  False = exact f32 parity path.
USE_BF16_MXU = True


def _layer_norm(x, gamma, beta):
    mu = jnp.mean(x, axis=-1, keepdims=True)
    var = jnp.mean((x - mu) ** 2, axis=-1, keepdims=True)
    return (x - mu) * jax.lax.rsqrt(var + LN_EPS) * gamma + beta


def _gelu_exact(x):
    # nn.GELU default = exact erf form (kept for parity; tanh/EUP form would offload VALU)
    return 0.5 * x * (1.0 + jax.lax.erf(x * jnp.float32(1.0 / np.sqrt(2.0))))


def encoder_block_kernel(x_ref, bias_ref,
                         wqkv_ref, bqkv_ref, wo_ref, bo_ref,
                         ln1_g_ref, ln1_b_ref, ln2_g_ref, ln2_b_ref,
                         w1_ref, b1_ref, w2_ref, b2_ref,
                         out_ref):
    bt, s, d = x_ref.shape                        # (B_TILE, S, D)
    mm_dtype = w1_ref.dtype                       # bf16 when USE_BF16_MXU, else f32
    x = x_ref[...].reshape(bt * s, d).astype(jnp.float32)   # leading-dim merge (layout no-op)
    bias = bias_ref[...]                          # (bt, 1, S) additive mask bias, f32

    # ---- pre-LN + multi-head self-attention ----
    residual = x
    h = _layer_norm(x, ln1_g_ref[...], ln1_b_ref[...])
    # fused QKV projection: one (bt*s, D) x (D, 3D) MXU matmul, f32 accumulate.
    # 1/sqrt(head_dim) is already folded into the Q columns of wqkv/bqkv.
    qkv = jnp.dot(h.astype(mm_dtype), wqkv_ref[...],
                  preferred_element_type=jnp.float32) + bqkv_ref[...]
    qkv = qkv.astype(mm_dtype).reshape(bt, s, 3 * d)         # leading-dim split (no-op)

    # Heads-batched attention: stack the per-head lane slices along a new MAJOR axis and run
    # one batched contraction for scores and one for P@V (single leading batch dim = h*bt),
    # instead of 8 tiny per-head MXU pushes + 4 separate softmaxes.
    q_stk = jnp.stack([qkv[:, :, hd * HEAD_DIM:(hd + 1) * HEAD_DIM]
                       for hd in range(N_HEADS)], axis=0)
    k_stk = jnp.stack([qkv[:, :, d + hd * HEAD_DIM:d + (hd + 1) * HEAD_DIM]
                       for hd in range(N_HEADS)], axis=0)
    v_stk = jnp.stack([qkv[:, :, 2 * d + hd * HEAD_DIM:2 * d + (hd + 1) * HEAD_DIM]
                       for hd in range(N_HEADS)], axis=0)
    q_stk = q_stk.reshape(N_HEADS * bt, s, HEAD_DIM)          # leading merges (no-ops)
    k_stk = k_stk.reshape(N_HEADS * bt, s, HEAD_DIM)
    v_stk = v_stk.reshape(N_HEADS * bt, s, HEAD_DIM)

    # batched scores, contracting last dims directly -> no XLU transpose
    scores = jnp.einsum('bqd,bkd->bqk', q_stk, k_stk,
                        preferred_element_type=jnp.float32)   # (H*bt, s, s)
    # mask-bias broadcast materialized exactly once (hoisted out of any per-head work)
    scores = scores.reshape(N_HEADS, bt, s, s) + bias
    m = jnp.max(scores, axis=-1, keepdims=True)
    p = jnp.exp(scores - m)
    p = p * pl.reciprocal(jnp.sum(p, axis=-1, keepdims=True), approx=True)   # EUP slot
    p = p.reshape(N_HEADS * bt, s, s).astype(mm_dtype)
    o = jnp.einsum('bqk,bkd->bqd', p, v_stk,
                   preferred_element_type=jnp.float32)        # (H*bt, s, hd)

    # heads back to lanes (same proven lane-concat as before), then ONE K=D output projection
    o = o.reshape(N_HEADS, bt, s, HEAD_DIM)
    attn = jnp.concatenate([o[hd] for hd in range(N_HEADS)], axis=-1)   # (bt, s, D)
    attn = attn.reshape(bt * s, d)
    attn = jnp.dot(attn.astype(mm_dtype), wo_ref[...],
                   preferred_element_type=jnp.float32) + bo_ref[...]
    x = residual + attn

    # ---- pre-LN + feed-forward (exact-erf GELU; dropout = identity in eval) ----
    residual = x
    h2 = _layer_norm(x, ln2_g_ref[...], ln2_b_ref[...])
    f = jnp.dot(h2.astype(mm_dtype), w1_ref[...],
                preferred_element_type=jnp.float32) + b1_ref[...]
    f = _gelu_exact(f)
    f = jnp.dot(f.astype(mm_dtype), w2_ref[...],
                preferred_element_type=jnp.float32) + b2_ref[...]
    out_ref[...] = (residual + f).reshape(bt, s, d).astype(out_ref.dtype)


def _tpu_generation():
    """Best-effort TPU generation + TensorCores-per-chip.  Defaults are safe."""
    gen, num_tc = 6, 1
    try:
        kind = jax.devices()[0].device_kind.lower()
        for g in (7, 6, 5, 4):
            if "v%d" % g in kind:
                gen = g
                break
        if gen >= 7:
            num_tc = 2            # v7x: 2 TCs/chip share the parallel grid axis
    except Exception:
        pass
    return gen, num_tc


def _vmem_estimate_bytes(bt, S):
    """Per-step VMEM working-set estimate (f32, lane-padding accounted for)."""
    f32 = 4
    rows = bt * S
    lane = 128
    # double-buffered x / out / mask blocks
    io = 2 * f32 * (2 * bt * S * D_MODEL + bt * S)
    # weights + biases + LN params (assume double-buffered worst case)
    w_words = (D_MODEL * 3 * D_MODEL + 3 * D_MODEL + D_MODEL * D_MODEL + D_MODEL
               + 4 * D_MODEL + D_MODEL * FF_DIM + FF_DIM + FF_DIM * D_MODEL + D_MODEL)
    weights = 2 * w_words * f32
    # live f32 intermediates: lane-dense (qkv, ffn, residuals) + lane-padded head stacks/scores
    dense = rows * (3 * D_MODEL + FF_DIM + 4 * D_MODEL) * f32
    head_stacks = 3 * N_HEADS * bt * S * max(HEAD_DIM, lane) * f32
    scores = 2 * N_HEADS * bt * S * max(S, lane) * f32
    return io + weights + dense + head_stacks + scores


def encoder_block(x, attention_mask, params):
    B, S, D = x.shape
    assert D == D_MODEL
    (wq, bq, wk, bk, wv, bv, wo, bo, g1, be1, g2, be2, w1, b1, w2, b2) = params

    # Wrapper-side fusions (plain XLA ops, tiny):
    scale = jnp.float32(1.0 / np.sqrt(HEAD_DIM))
    wqkv = jnp.concatenate([wq * scale, wk, wv], axis=1)      # (D, 3D), scale folded into Q
    bqkv = jnp.concatenate([bq * scale, bk, bv], axis=1)      # (1, 3D)
    # additive mask bias: 0 where attended, -1e9 where masked
    mask_bias = ((attention_mask.astype(jnp.float32) - 1.0) * 1e9).reshape(B, 1, S)

    mm_dtype = jnp.bfloat16 if USE_BF16_MXU else jnp.float32
    wqkv_c, wo_c, w1_c, w2_c = (w.astype(mm_dtype) for w in (wqkv, wo, w1, w2))

    # Generation-aware row tiling + VMEM budgeting (review items).
    gen, num_tc = _tpu_generation()
    rows_target = 128 if gen <= 5 else 256                    # MXU M-dim per generation
    bt = min(B, max(1, rows_target // max(S, 1)))
    if num_tc > 1 and B >= num_tc:
        bt = min(bt, pl.cdiv(B, num_tc))                      # >= 2 grid steps for v7x megacore
    phys_vmem = (64 << 20) if gen >= 7 else (128 << 20)
    vmem_budget = phys_vmem // 2
    while bt > 1 and _vmem_estimate_bytes(bt, S) > int(0.8 * vmem_budget):
        bt = max(1, bt // 2)
    grid_steps = pl.cdiv(B, bt)

    def const_spec(shape):
        idx = (lambda i: (0,) * len(shape))
        if grid_steps > 1:
            # constant-index blocks never change across steps: single-buffer them
            return pl.BlockSpec(shape, idx, pipeline_mode=pl.Buffered(1))
        return pl.BlockSpec(shape, idx)

    in_specs = [
        pl.BlockSpec((bt, S, D), lambda i: (i, 0, 0)),        # x
        pl.BlockSpec((bt, 1, S), lambda i: (i, 0, 0)),        # mask bias
        const_spec((D, 3 * D)), const_spec((1, 3 * D)),       # wqkv, bqkv (fused)
        const_spec((D, D)), const_spec((1, D)),               # wo, bo
        const_spec((1, D)), const_spec((1, D)),               # ln1 gamma, beta
        const_spec((1, D)), const_spec((1, D)),               # ln2 gamma, beta
        const_spec((D, FF_DIM)), const_spec((1, FF_DIM)),     # w1, b1
        const_spec((FF_DIM, D)), const_spec((1, D)),          # w2, b2
    ]
    return pl.pallas_call(
        encoder_block_kernel,
        out_shape=jax.ShapeDtypeStruct((B, S, D), x.dtype),
        grid_spec=pltpu.PrefetchScalarGridSpec(
            num_scalar_prefetch=0,
            grid=(grid_steps,),
            in_specs=in_specs,
            out_specs=pl.BlockSpec((bt, S, D), lambda i: (i, 0, 0)),
        ),
        compiler_params=pltpu.CompilerParams(
            dimension_semantics=("parallel",),
            vmem_limit_bytes=int(vmem_budget),
        ),
    )(x, mask_bias, wqkv_c, bqkv, wo_c, bo, g1, be1, g2, be2, w1_c, b1, w2_c, b2)


def ref_encoder_block(x, attention_mask, params):
    (wq, bq, wk, bk, wv, bv, wo, bo, g1, be1, g2, be2, w1, b1, w2, b2) = params
    B, S, D = x.shape

    def ln(v, g, b):
        mu = v.mean(-1, keepdims=True)
        var = ((v - mu) ** 2).mean(-1, keepdims=True)
        return (v - mu) / jnp.sqrt(var + LN_EPS) * g + b

    residual = x
    h = ln(x, g1, be1)
    q, k, v = h @ wq + bq, h @ wk + bk, h @ wv + bv

    def split(t):
        return t.reshape(B, S, N_HEADS, HEAD_DIM).transpose(0, 2, 1, 3)

    qh, kh, vh = split(q), split(k), split(v)
    scores = jnp.einsum('bhqd,bhkd->bhqk', qh, kh) / jnp.sqrt(jnp.float32(HEAD_DIM))
    m = attention_mask[:, None, None, :]                       # (B,1,1,S) -> broadcast over queries
    scores = jnp.where(m > 0, scores, jnp.float32(-1e9))
    p = jax.nn.softmax(scores, axis=-1)
    o = jnp.einsum('bhqk,bhkd->bhqd', p, vh).transpose(0, 2, 1, 3).reshape(B, S, D)
    x = o @ wo + bo + residual

    residual = x
    h2 = ln(x, g2, be2)
    f = h2 @ w1 + b1
    f = 0.5 * f * (1.0 + jax.lax.erf(f / jnp.sqrt(jnp.float32(2.0))))
    f = f @ w2 + b2
    return f + residual


def make_params(key):
    ks = jax.random.split(key, 12)
    std = 0.05
    wq = jax.random.normal(ks[0], (D_MODEL, D_MODEL), jnp.float32) * std
    wk = jax.random.normal(ks[1], (D_MODEL, D_MODEL), jnp.float32) * std
    wv = jax.random.normal(ks[2], (D_MODEL, D_MODEL), jnp.float32) * std
    wo = jax.random.normal(ks[3], (D_MODEL, D_MODEL), jnp.float32) * std
    bq = jax.random.normal(ks[4], (1, D_MODEL), jnp.float32) * std
    bk = jax.random.normal(ks[5], (1, D_MODEL), jnp.float32) * std
    bv = jax.random.normal(ks[6], (1, D_MODEL), jnp.float32) * std
    bo = jax.random.normal(ks[7], (1, D_MODEL), jnp.float32) * std
    g1 = jnp.ones((1, D_MODEL), jnp.float32)
    be1 = jnp.zeros((1, D_MODEL), jnp.float32)
    g2 = jnp.ones((1, D_MODEL), jnp.float32)
    be2 = jnp.zeros((1, D_MODEL), jnp.float32)
    w1 = jax.random.normal(ks[8], (D_MODEL, FF_DIM), jnp.float32) * std
    b1 = jax.random.normal(ks[9], (1, FF_DIM), jnp.float32) * std
    w2 = jax.random.normal(ks[10], (FF_DIM, D_MODEL), jnp.float32) * std
    b2 = jax.random.normal(ks[11], (1, D_MODEL), jnp.float32) * std
    return (wq, bq, wk, bk, wv, bv, wo, bo, g1, be1, g2, be2, w1, b1, w2, b2)


if __name__ == "__main__":
    B, S = 2, 8
    key = jax.random.PRNGKey(0)
    kx, kp = jax.random.split(key)
    x = jax.random.normal(kx, (B, S, D_MODEL), jnp.float32)
    # attention_mask: (B, S), 1 = valid token, 0 = padding (last 2 positions of batch 1 masked)
    attention_mask = jnp.ones((B, S), jnp.float32).at[1, -2:].set(0.0)
    params = make_params(kp)

    out = jax.block_until_ready(encoder_block(x, attention_mask, params))

    ref = ref_encoder_block(x, attention_mask, params)
    # bf16 MXU operands (f32 accumulate) carry ~2^-9 relative rounding per operand; the
    # f32 path keeps the original 1e-3 parity tolerance.
    tol = 5e-3 if USE_BF16_MXU else 1e-3
    np.testing.assert_allclose(np.asarray(out), np.asarray(ref), atol=tol, rtol=tol)
    print("KERNEL_OK")
</pallas_src>

<mosaic_0001>
module attributes {stable_mosaic.version = 11 : i64} {
  func.func @encoder_block_kernel(%arg0: i32, %arg1: memref<2x8x32xf32, #tpu.memory_space<vmem>>, %arg2: memref<2x1x8xf32, #tpu.memory_space<vmem>>, %arg3: memref<32x96xbf16, #tpu.memory_space<vmem>>, %arg4: memref<1x96xf32, #tpu.memory_space<vmem>>, %arg5: memref<32x32xbf16, #tpu.memory_space<vmem>>, %arg6: memref<1x32xf32, #tpu.memory_space<vmem>>, %arg7: memref<1x32xf32, #tpu.memory_space<vmem>>, %arg8: memref<1x32xf32, #tpu.memory_space<vmem>>, %arg9: memref<1x32xf32, #tpu.memory_space<vmem>>, %arg10: memref<1x32xf32, #tpu.memory_space<vmem>>, %arg11: memref<32x64xbf16, #tpu.memory_space<vmem>>, %arg12: memref<1x64xf32, #tpu.memory_space<vmem>>, %arg13: memref<64x32xbf16, #tpu.memory_space<vmem>>, %arg14: memref<1x32xf32, #tpu.memory_space<vmem>>, %arg15: memref<2x8x32xf32, #tpu.memory_space<vmem>>) attributes {dimension_semantics = [#tpu.dimension_semantics<parallel>], iteration_bounds = array<i64: 1>, scalar_prefetch = 0 : i64, scratch_operands = 0 : i64, tpu.core_type = #tpu.core_type<tc>, window_params = [{transform_indices = @transform_0, window_bounds = array<i64: 2, 8, 32>}, {transform_indices = @transform_1, window_bounds = array<i64: 2, 1, 8>}, {pipeline_mode = #tpu.pipeline_mode<synchronous>, transform_indices = @transform_2, window_bounds = array<i64: 32, 96>}, {pipeline_mode = #tpu.pipeline_mode<synchronous>, transform_indices = @transform_3, window_bounds = array<i64: 1, 96>}, {pipeline_mode = #tpu.pipeline_mode<synchronous>, transform_indices = @transform_4, window_bounds = array<i64: 32, 32>}, {pipeline_mode = #tpu.pipeline_mode<synchronous>, transform_indices = @transform_5, window_bounds = array<i64: 1, 32>}, {pipeline_mode = #tpu.pipeline_mode<synchronous>, transform_indices = @transform_6, window_bounds = array<i64: 1, 32>}, {pipeline_mode = #tpu.pipeline_mode<synchronous>, transform_indices = @transform_7, window_bounds = array<i64: 1, 32>}, {pipeline_mode = #tpu.pipeline_mode<synchronous>, transform_indices = @transform_8, window_bounds = array<i64: 1, 32>}, {pipeline_mode = #tpu.pipeline_mode<synchronous>, transform_indices = @transform_9, window_bounds = array<i64: 1, 32>}, {pipeline_mode = #tpu.pipeline_mode<synchronous>, transform_indices = @transform_10, window_bounds = array<i64: 32, 64>}, {pipeline_mode = #tpu.pipeline_mode<synchronous>, transform_indices = @transform_11, window_bounds = array<i64: 1, 64>}, {pipeline_mode = #tpu.pipeline_mode<synchronous>, transform_indices = @transform_12, window_bounds = array<i64: 64, 32>}, {pipeline_mode = #tpu.pipeline_mode<synchronous>, transform_indices = @transform_13, window_bounds = array<i64: 1, 32>}, {transform_indices = @transform_14, window_bounds = array<i64: 2, 8, 32>}]} {
    %c0 = arith.constant 0 : index
    %c0_0 = arith.constant 0 : index
    %c0_1 = arith.constant 0 : index
    %0 = vector.load %arg1[%c0, %c0_0, %c0_1] : memref<2x8x32xf32, #tpu.memory_space<vmem>>, vector<2x8x32xf32>
    %1 = vector.shape_cast %0 : vector<2x8x32xf32> to vector<16x32xf32>
    %c0_2 = arith.constant 0 : index
    %c0_3 = arith.constant 0 : index
    %c0_4 = arith.constant 0 : index
    %2 = vector.load %arg2[%c0_2, %c0_3, %c0_4] : memref<2x1x8xf32, #tpu.memory_space<vmem>>, vector<2x1x8xf32>
    %c0_5 = arith.constant 0 : index
    %c0_6 = arith.constant 0 : index
    %3 = vector.load %arg7[%c0_5, %c0_6] : memref<1x32xf32, #tpu.memory_space<vmem>>, vector<1x32xf32>
    %c0_7 = arith.constant 0 : index
    %c0_8 = arith.constant 0 : index
    %4 = vector.load %arg8[%c0_7, %c0_8] : memref<1x32xf32, #tpu.memory_space<vmem>>, vector<1x32xf32>
    %cst = arith.constant dense<0.000000e+00> : vector<16xf32>
    %5 = vector.multi_reduction <add>, %1, %cst [1] : vector<16x32xf32> to vector<16xf32>
    %6 = vector.shape_cast %5 : vector<16xf32> to vector<16x1xf32>
    %cst_9 = arith.constant 3.200000e+01 : f32
    %7 = vector.broadcast %cst_9 : f32 to vector<16x1xf32>
    %8 = arith.divf %6, %7 : vector<16x1xf32>
    %9 = vector.broadcast %8 : vector<16x1xf32> to vector<16x32xf32>
    %10 = arith.subf %1, %9 : vector<16x32xf32>
    %11 = arith.mulf %10, %10 : vector<16x32xf32>
    %cst_10 = arith.constant dense<0.000000e+00> : vector<16xf32>
    %12 = vector.multi_reduction <add>, %11, %cst_10 [1] : vector<16x32xf32> to vector<16xf32>
    %13 = vector.shape_cast %12 : vector<16xf32> to vector<16x1xf32>
    %cst_11 = arith.constant 3.200000e+01 : f32
    %14 = vector.broadcast %cst_11 : f32 to vector<16x1xf32>
    %15 = arith.divf %13, %14 : vector<16x1xf32>
    %16 = vector.broadcast %8 : vector<16x1xf32> to vector<16x32xf32>
    %17 = arith.subf %1, %16 : vector<16x32xf32>
    %cst_12 = arith.constant 9.99999974E-6 : f32
    %18 = vector.broadcast %cst_12 : f32 to vector<16x1xf32>
    %19 = arith.addf %15, %18 : vector<16x1xf32>
    %20 = math.rsqrt %19 : vector<16x1xf32>
    %21 = vector.broadcast %20 : vector<16x1xf32> to vector<16x32xf32>
    %22 = arith.mulf %17, %21 : vector<16x32xf32>
    %23 = vector.broadcast %3 : vector<1x32xf32> to vector<16x32xf32>
    %24 = arith.mulf %22, %23 : vector<16x32xf32>
    %25 = vector.broadcast %4 : vector<1x32xf32> to vector<16x32xf32>
    %26 = arith.addf %24, %25 : vector<16x32xf32>
    %27 = arith.truncf %26 : vector<16x32xf32> to vector<16x32xbf16>
    %c0_13 = arith.constant 0 : index
    %c0_14 = arith.constant 0 : index
    %28 = vector.load %arg3[%c0_13, %c0_14] : memref<32x96xbf16, #tpu.memory_space<vmem>>, vector<32x96xbf16>
    %cst_15 = arith.constant dense<0.000000e+00> : vector<16x96xf32>
    %29 = tpu.matmul %27, %28, %cst_15 {dimension_numbers = #tpu.dot_dimension_numbers<[1], [0], [0], [1], [0, 0, 1, 1], [], []>} : vector<16x32xbf16>, vector<32x96xbf16>, vector<16x96xf32> -> vector<16x96xf32>
    %c0_16 = arith.constant 0 : index
    %c0_17 = arith.constant 0 : index
    %30 = vector.load %arg4[%c0_16, %c0_17] : memref<1x96xf32, #tpu.memory_space<vmem>>, vector<1x96xf32>
    %31 = vector.broadcast %30 : vector<1x96xf32> to vector<16x96xf32>
    %32 = arith.addf %29, %31 : vector<16x96xf32>
    %33 = arith.truncf %32 : vector<16x96xf32> to vector<16x96xbf16>
    %34 = vector.shape_cast %33 : vector<16x96xbf16> to vector<2x8x96xbf16>
    %35 = vector.extract_strided_slice %34 {offsets = [0, 0, 0], sizes = [2, 8, 8], strides = [1, 1, 1]} : vector<2x8x96xbf16> to vector<2x8x8xbf16>
    %36 = vector.extract_strided_slice %34 {offsets = [0, 0, 8], sizes = [2, 8, 8], strides = [1, 1, 1]} : vector<2x8x96xbf16> to vector<2x8x8xbf16>
    %37 = vector.extract_strided_slice %34 {offsets = [0, 0, 16], sizes = [2, 8, 8], strides = [1, 1, 1]} : vector<2x8x96xbf16> to vector<2x8x8xbf16>
    %38 = vector.extract_strided_slice %34 {offsets = [0, 0, 24], sizes = [2, 8, 8], strides = [1, 1, 1]} : vector<2x8x96xbf16> to vector<2x8x8xbf16>
    %39 = vector.shape_cast %35 : vector<2x8x8xbf16> to vector<1x2x8x8xbf16>
    %40 = vector.shape_cast %36 : vector<2x8x8xbf16> to vector<1x2x8x8xbf16>
    %41 = vector.shape_cast %37 : vector<2x8x8xbf16> to vector<1x2x8x8xbf16>
    %42 = vector.shape_cast %38 : vector<2x8x8xbf16> to vector<1x2x8x8xbf16>
    %43 = tpu.concatenate %39, %40, %41, %42 in 0 : vector<1x2x8x8xbf16>, vector<1x2x8x8xbf16>, vector<1x2x8x8xbf16>, vector<1x2x8x8xbf16> -> vector<4x2x8x8xbf16>
    %44 = vector.extract_strided_slice %34 {offsets = [0, 0, 32], sizes = [2, 8, 8], strides = [1, 1, 1]} : vector<2x8x96xbf16> to vector<2x8x8xbf16>
    %45 = vector.extract_strided_slice %34 {offsets = [0, 0, 40], sizes = [2, 8, 8], strides = [1, 1, 1]} : vector<2x8x96xbf16> to vector<2x8x8xbf16>
    %46 = vector.extract_strided_slice %34 {offsets = [0, 0, 48], sizes = [2, 8, 8], strides = [1, 1, 1]} : vector<2x8x96xbf16> to vector<2x8x8xbf16>
    %47 = vector.extract_strided_slice %34 {offsets = [0, 0, 56], sizes = [2, 8, 8], strides = [1, 1, 1]} : vector<2x8x96xbf16> to vector<2x8x8xbf16>
    %48 = vector.shape_cast %44 : vector<2x8x8xbf16> to vector<1x2x8x8xbf16>
    %49 = vector.shape_cast %45 : vector<2x8x8xbf16> to vector<1x2x8x8xbf16>
    %50 = vector.shape_cast %46 : vector<2x8x8xbf16> to vector<1x2x8x8xbf16>
    %51 = vector.shape_cast %47 : vector<2x8x8xbf16> to vector<1x2x8x8xbf16>
    %52 = tpu.concatenate %48, %49, %50, %51 in 0 : vector<1x2x8x8xbf16>, vector<1x2x8x8xbf16>, vector<1x2x8x8xbf16>, vector<1x2x8x8xbf16> -> vector<4x2x8x8xbf16>
    %53 = vector.extract_strided_slice %34 {offsets = [0, 0, 64], sizes = [2, 8, 8], strides = [1, 1, 1]} : vector<2x8x96xbf16> to vector<2x8x8xbf16>
    %54 = vector.extract_strided_slice %34 {offsets = [0, 0, 72], sizes = [2, 8, 8], strides = [1, 1, 1]} : vector<2x8x96xbf16> to vector<2x8x8xbf16>
    %55 = vector.extract_strided_slice %34 {offsets = [0, 0, 80], sizes = [2, 8, 8], strides = [1, 1, 1]} : vector<2x8x96xbf16> to vector<2x8x8xbf16>
    %56 = vector.extract_strided_slice %34 {offsets = [0, 0, 88], sizes = [2, 8, 8], strides = [1, 1, 1]} : vector<2x8x96xbf16> to vector<2x8x8xbf16>
    %57 = vector.shape_cast %53 : vector<2x8x8xbf16> to vector<1x2x8x8xbf16>
    %58 = vector.shape_cast %54 : vector<2x8x8xbf16> to vector<1x2x8x8xbf16>
    %59 = vector.shape_cast %55 : vector<2x8x8xbf16> to vector<1x2x8x8xbf16>
    %60 = vector.shape_cast %56 : vector<2x8x8xbf16> to vector<1x2x8x8xbf16>
    %61 = tpu.concatenate %57, %58, %59, %60 in 0 : vector<1x2x8x8xbf16>, vector<1x2x8x8xbf16>, vector<1x2x8x8xbf16>, vector<1x2x8x8xbf16> -> vector<4x2x8x8xbf16>
    %62 = vector.shape_cast %43 : vector<4x2x8x8xbf16> to vector<8x8x8xbf16>
    %63 = vector.shape_cast %52 : vector<4x2x8x8xbf16> to vector<8x8x8xbf16>
    %64 = vector.shape_cast %61 : vector<4x2x8x8xbf16> to vector<8x8x8xbf16>
    "tpu.trace_start"() <{level = 10 : i32, message = "bqd,bkd->bqk"}> : () -> ()
    %cst_18 = arith.constant dense<0.000000e+00> : vector<8x8x8xf32>
    %65 = tpu.matmul %62, %63, %cst_18 {dimension_numbers = #tpu.dot_dimension_numbers<[2], [2], [1], [1], [0, 0, 0, 1, 1, 1], [0], [0]>} : vector<8x8x8xbf16>, vector<8x8x8xbf16>, vector<8x8x8xf32> -> vector<8x8x8xf32>
    "tpu.trace_stop"() : () -> ()
    %66 = vector.shape_cast %65 : vector<8x8x8xf32> to vector<4x2x8x8xf32>
    %67 = vector.shape_cast %2 : vector<2x1x8xf32> to vector<1x2x1x8xf32>
    %68 = vector.broadcast %67 : vector<1x2x1x8xf32> to vector<4x2x8x8xf32>
    %69 = arith.addf %66, %68 : vector<4x2x8x8xf32>
    %cst_19 = arith.constant dense<0xFF800000> : vector<4x2x8xf32>
    %70 = vector.multi_reduction <maximumf>, %69, %cst_19 [3] : vector<4x2x8x8xf32> to vector<4x2x8xf32>
    %71 = vector.shape_cast %70 : vector<4x2x8xf32> to vector<4x2x8x1xf32>
    %72 = vector.broadcast %71 : vector<4x2x8x1xf32> to vector<4x2x8x8xf32>
    %73 = arith.subf %69, %72 : vector<4x2x8x8xf32>
    %74 = math.exp %73 : vector<4x2x8x8xf32>
    %cst_20 = arith.constant dense<0.000000e+00> : vector<4x2x8xf32>
    %75 = vector.multi_reduction <add>, %74, %cst_20 [3] : vector<4x2x8x8xf32> to vector<4x2x8xf32>
    %76 = vector.shape_cast %75 : vector<4x2x8xf32> to vector<4x2x8x1xf32>
    %77 = tpu.reciprocal %76 {approx = true} : vector<4x2x8x1xf32> -> vector<4x2x8x1xf32>
    %78 = vector.broadcast %77 : vector<4x2x8x1xf32> to vector<4x2x8x8xf32>
    %79 = arith.mulf %74, %78 : vector<4x2x8x8xf32>
    %80 = vector.shape_cast %79 : vector<4x2x8x8xf32> to vector<8x8x8xf32>
    %81 = arith.truncf %80 : vector<8x8x8xf32> to vector<8x8x8xbf16>
    "tpu.trace_start"() <{level = 10 : i32, message = "bqk,bkd->bqd"}> : () -> ()
    %cst_21 = arith.constant dense<0.000000e+00> : vector<8x8x8xf32>
    %82 = tpu.matmul %81, %64, %cst_21 {dimension_numbers = #tpu.dot_dimension_numbers<[2], [1], [1], [2], [0, 0, 0, 1, 1, 2], [0], [0]>} : vector<8x8x8xbf16>, vector<8x8x8xbf16>, vector<8x8x8xf32> -> vector<8x8x8xf32>
    "tpu.trace_stop"() : () -> ()
    %83 = vector.shape_cast %82 : vector<8x8x8xf32> to vector<4x2x8x8xf32>
    %84 = vector.extract_strided_slice %83 {offsets = [0, 0, 0, 0], sizes = [1, 2, 8, 8], strides = [1, 1, 1, 1]} : vector<4x2x8x8xf32> to vector<1x2x8x8xf32>
    %85 = vector.shape_cast %84 : vector<1x2x8x8xf32> to vector<2x8x8xf32>
    %86 = vector.extract_strided_slice %83 {offsets = [1, 0, 0, 0], sizes = [1, 2, 8, 8], strides = [1, 1, 1, 1]} : vector<4x2x8x8xf32> to vector<1x2x8x8xf32>
    %87 = vector.shape_cast %86 : vector<1x2x8x8xf32> to vector<2x8x8xf32>
    %88 = vector.extract_strided_slice %83 {offsets = [2, 0, 0, 0], sizes = [1, 2, 8, 8], strides = [1, 1, 1, 1]} : vector<4x2x8x8xf32> to vector<1x2x8x8xf32>
    %89 = vector.shape_cast %88 : vector<1x2x8x8xf32> to vector<2x8x8xf32>
    %90 = vector.extract_strided_slice %83 {offsets = [3, 0, 0, 0], sizes = [1, 2, 8, 8], strides = [1, 1, 1, 1]} : vector<4x2x8x8xf32> to vector<1x2x8x8xf32>
    %91 = vector.shape_cast %90 : vector<1x2x8x8xf32> to vector<2x8x8xf32>
    %92 = tpu.concatenate %85, %87, %89, %91 in 2 : vector<2x8x8xf32>, vector<2x8x8xf32>, vector<2x8x8xf32>, vector<2x8x8xf32> -> vector<2x8x32xf32>
    %93 = vector.shape_cast %92 : vector<2x8x32xf32> to vector<16x32xf32>
    %94 = arith.truncf %93 : vector<16x32xf32> to vector<16x32xbf16>
    %c0_22 = arith.constant 0 : index
    %c0_23 = arith.constant 0 : index
    %95 = vector.load %arg5[%c0_22, %c0_23] : memref<32x32xbf16, #tpu.memory_space<vmem>>, vector<32x32xbf16>
    %cst_24 = arith.constant dense<0.000000e+00> : vector<16x32xf32>
    %96 = tpu.matmul %94, %95, %cst_24 {dimension_numbers = #tpu.dot_dimension_numbers<[1], [0], [0], [1], [0, 0, 1, 1], [], []>} : vector<16x32xbf16>, vector<32x32xbf16>, vector<16x32xf32> -> vector<16x32xf32>
    %c0_25 = arith.constant 0 : index
    %c0_26 = arith.constant 0 : index
    %97 = vector.load %arg6[%c0_25, %c0_26] : memref<1x32xf32, #tpu.memory_space<vmem>>, vector<1x32xf32>
    %98 = vector.broadcast %97 : vector<1x32xf32> to vector<16x32xf32>
    %99 = arith.addf %96, %98 : vector<16x32xf32>
    %100 = arith.addf %1, %99 : vector<16x32xf32>
    %c0_27 = arith.constant 0 : index
    %c0_28 = arith.constant 0 : index
    %101 = vector.load %arg9[%c0_27, %c0_28] : memref<1x32xf32, #tpu.memory_space<vmem>>, vector<1x32xf32>
    %c0_29 = arith.constant 0 : index
    %c0_30 = arith.constant 0 : index
    %102 = vector.load %arg10[%c0_29, %c0_30] : memref<1x32xf32, #tpu.memory_space<vmem>>, vector<1x32xf32>
    %cst_31 = arith.constant dense<0.000000e+00> : vector<16xf32>
    %103 = vector.multi_reduction <add>, %100, %cst_31 [1] : vector<16x32xf32> to vector<16xf32>
    %104 = vector.shape_cast %103 : vector<16xf32> to vector<16x1xf32>
    %cst_32 = arith.constant 3.200000e+01 : f32
    %105 = vector.broadcast %cst_32 : f32 to vector<16x1xf32>
    %106 = arith.divf %104, %105 : vector<16x1xf32>
    %107 = vector.broadcast %106 : vector<16x1xf32> to vector<16x32xf32>
    %108 = arith.subf %100, %107 : vector<16x32xf32>
    %109 = arith.mulf %108, %108 : vector<16x32xf32>
    %cst_33 = arith.constant dense<0.000000e+00> : vector<16xf32>
    %110 = vector.multi_reduction <add>, %109, %cst_33 [1] : vector<16x32xf32> to vector<16xf32>
    %111 = vector.shape_cast %110 : vector<16xf32> to vector<16x1xf32>
    %cst_34 = arith.constant 3.200000e+01 : f32
    %112 = vector.broadcast %cst_34 : f32 to vector<16x1xf32>
    %113 = arith.divf %111, %112 : vector<16x1xf32>
    %114 = vector.broadcast %106 : vector<16x1xf32> to vector<16x32xf32>
    %115 = arith.subf %100, %114 : vector<16x32xf32>
    %cst_35 = arith.constant 9.99999974E-6 : f32
    %116 = vector.broadcast %cst_35 : f32 to vector<16x1xf32>
    %117 = arith.addf %113, %116 : vector<16x1xf32>
    %118 = math.rsqrt %117 : vector<16x1xf32>
    %119 = vector.broadcast %118 : vector<16x1xf32> to vector<16x32xf32>
    %120 = arith.mulf %115, %119 : vector<16x32xf32>
    %121 = vector.broadcast %101 : vector<1x32xf32> to vector<16x32xf32>
    %122 = arith.mulf %120, %121 : vector<16x32xf32>
    %123 = vector.broadcast %102 : vector<1x32xf32> to vector<16x32xf32>
    %124 = arith.addf %122, %123 : vector<16x32xf32>
    %125 = arith.truncf %124 : vector<16x32xf32> to vector<16x32xbf16>
    %c0_36 = arith.constant 0 : index
    %c0_37 = arith.constant 0 : index
    %126 = vector.load %arg11[%c0_36, %c0_37] : memref<32x64xbf16, #tpu.memory_space<vmem>>, vector<32x64xbf16>
    %cst_38 = arith.constant dense<0.000000e+00> : vector<16x64xf32>
    %127 = tpu.matmul %125, %126, %cst_38 {dimension_numbers = #tpu.dot_dimension_numbers<[1], [0], [0], [1], [0, 0, 1, 1], [], []>} : vector<16x32xbf16>, vector<32x64xbf16>, vector<16x64xf32> -> vector<16x64xf32>
    %c0_39 = arith.constant 0 : index
    %c0_40 = arith.constant 0 : index
    %128 = vector.load %arg12[%c0_39, %c0_40] : memref<1x64xf32, #tpu.memory_space<vmem>>, vector<1x64xf32>
    %129 = vector.broadcast %128 : vector<1x64xf32> to vector<16x64xf32>
    %130 = arith.addf %127, %129 : vector<16x64xf32>
    %cst_41 = arith.constant 5.000000e-01 : f32
    %131 = vector.broadcast %cst_41 : f32 to vector<16x64xf32>
    %132 = arith.mulf %131, %130 : vector<16x64xf32>
    %cst_42 = arith.constant 0.707106769 : f32
    %133 = vector.broadcast %cst_42 : f32 to vector<16x64xf32>
    %134 = arith.mulf %130, %133 : vector<16x64xf32>
    %135 = math.erf %134 : vector<16x64xf32>
    %cst_43 = arith.constant 1.000000e+00 : f32
    %136 = vector.broadcast %cst_43 : f32 to vector<16x64xf32>
    %137 = arith.addf %136, %135 : vector<16x64xf32>
    %138 = arith.mulf %132, %137 : vector<16x64xf32>
    %139 = arith.truncf %138 : vector<16x64xf32> to vector<16x64xbf16>
    %c0_44 = arith.constant 0 : index
    %c0_45 = arith.constant 0 : index
    %140 = vector.load %arg13[%c0_44, %c0_45] : memref<64x32xbf16, #tpu.memory_space<vmem>>, vector<64x32xbf16>
    %cst_46 = arith.constant dense<0.000000e+00> : vector<16x32xf32>
    %141 = tpu.matmul %139, %140, %cst_46 {dimension_numbers = #tpu.dot_dimension_numbers<[1], [0], [0], [1], [0, 0, 1, 1], [], []>} : vector<16x64xbf16>, vector<64x32xbf16>, vector<16x32xf32> -> vector<16x32xf32>
    %c0_47 = arith.constant 0 : index
    %c0_48 = arith.constant 0 : index
    %142 = vector.load %arg14[%c0_47, %c0_48] : memref<1x32xf32, #tpu.memory_space<vmem>>, vector<1x32xf32>
    %143 = vector.broadcast %142 : vector<1x32xf32> to vector<16x32xf32>
    %144 = arith.addf %141, %143 : vector<16x32xf32>
    %145 = arith.addf %100, %144 : vector<16x32xf32>
    %146 = vector.shape_cast %145 : vector<16x32xf32> to vector<2x8x32xf32>
    %c0_49 = arith.constant 0 : index
    %c0_50 = arith.constant 0 : index
    %c0_51 = arith.constant 0 : index
    %147 = vector.load %arg15[%c0_49, %c0_50, %c0_51] : memref<2x8x32xf32, #tpu.memory_space<vmem>>, vector<2x8x32xf32>
    tpu.vector_store %arg15[%c0_49, %c0_50, %c0_51], %146 {strides = array<i32>} : memref<2x8x32xf32, #tpu.memory_space<vmem>>, vector<2x8x32xf32>,
    return
  }
  func.func @transform_0(%arg0: i32) -> (i32, i32, i32) {
    %c0_i32 = arith.constant 0 : i32
    %c0_i32_0 = arith.constant 0 : i32
    %c0_i32_1 = arith.constant 0 : i32
    return %arg0, %c0_i32, %c0_i32_0 : i32, i32, i32
  }
  func.func @transform_1(%arg0: i32) -> (i32, i32, i32) {
    %c0_i32 = arith.constant 0 : i32
    %c0_i32_0 = arith.constant 0 : i32
    %c0_i32_1 = arith.constant 0 : i32
    return %arg0, %c0_i32, %c0_i32_0 : i32, i32, i32
  }
  func.func @transform_2(%arg0: i32) -> (i32, i32) {
    %c0_i32 = arith.constant 0 : i32
    %c0_i32_0 = arith.constant 0 : i32
    %c0_i32_1 = arith.constant 0 : i32
    return %c0_i32, %c0_i32_0 : i32, i32
  }
  func.func @transform_3(%arg0: i32) -> (i32, i32) {
    %c0_i32 = arith.constant 0 : i32
    %c0_i32_0 = arith.constant 0 : i32
    %c0_i32_1 = arith.constant 0 : i32
    return %c0_i32, %c0_i32_0 : i32, i32
  }
  func.func @transform_4(%arg0: i32) -> (i32, i32) {
    %c0_i32 = arith.constant 0 : i32
    %c0_i32_0 = arith.constant 0 : i32
    %c0_i32_1 = arith.constant 0 : i32
    return %c0_i32, %c0_i32_0 : i32, i32
  }
  func.func @transform_5(%arg0: i32) -> (i32, i32) {
    %c0_i32 = arith.constant 0 : i32
    %c0_i32_0 = arith.constant 0 : i32
    %c0_i32_1 = arith.constant 0 : i32
    return %c0_i32, %c0_i32_0 : i32, i32
  }
  func.func @transform_6(%arg0: i32) -> (i32, i32) {
    %c0_i32 = arith.constant 0 : i32
    %c0_i32_0 = arith.constant 0 : i32
    %c0_i32_1 = arith.constant 0 : i32
    return %c0_i32, %c0_i32_0 : i32, i32
  }
  func.func @transform_7(%arg0: i32) -> (i32, i32) {
    %c0_i32 = arith.constant 0 : i32
    %c0_i32_0 = arith.constant 0 : i32
    %c0_i32_1 = arith.constant 0 : i32
    return %c0_i32, %c0_i32_0 : i32, i32
  }
  func.func @transform_8(%arg0: i32) -> (i32, i32) {
    %c0_i32 = arith.constant 0 : i32
    %c0_i32_0 = arith.constant 0 : i32
    %c0_i32_1 = arith.constant 0 : i32
    return %c0_i32, %c0_i32_0 : i32, i32
  }
  func.func @transform_9(%arg0: i32) -> (i32, i32) {
    %c0_i32 = arith.constant 0 : i32
    %c0_i32_0 = arith.constant 0 : i32
    %c0_i32_1 = arith.constant 0 : i32
    return %c0_i32, %c0_i32_0 : i32, i32
  }
  func.func @transform_10(%arg0: i32) -> (i32, i32) {
    %c0_i32 = arith.constant 0 : i32
    %c0_i32_0 = arith.constant 0 : i32
    %c0_i32_1 = arith.constant 0 : i32
    return %c0_i32, %c0_i32_0 : i32, i32
  }
  func.func @transform_11(%arg0: i32) -> (i32, i32) {
    %c0_i32 = arith.constant 0 : i32
    %c0_i32_0 = arith.constant 0 : i32
    %c0_i32_1 = arith.constant 0 : i32
    return %c0_i32, %c0_i32_0 : i32, i32
  }
  func.func @transform_12(%arg0: i32) -> (i32, i32) {
    %c0_i32 = arith.constant 0 : i32
    %c0_i32_0 = arith.constant 0 : i32
    %c0_i32_1 = arith.constant 0 : i32
    return %c0_i32, %c0_i32_0 : i32, i32
  }
  func.func @transform_13(%arg0: i32) -> (i32, i32) {
    %c0_i32 = arith.constant 0 : i32
    %c0_i32_0 = arith.constant 0 : i32
    %c0_i32_1 = arith.constant 0 : i32
    return %c0_i32, %c0_i32_0 : i32, i32
  }
  func.func @transform_14(%arg0: i32) -> (i32, i32, i32) {
    %c0_i32 = arith.constant 0 : i32
    %c0_i32_0 = arith.constant 0 : i32
    %c0_i32_1 = arith.constant 0 : i32
    return %arg0, %c0_i32, %c0_i32_0 : i32, i32, i32
  }
}

</mosaic_0001>

<bundles_post_ra>
// kernel: tpu_custom_call.1
= control target key start
LH: loop header
LB: loop body
LE: loop exit
PB: predicated region body
PF: predicated region fallthrough
CT: control target
= control target key end

     0   :  { %19 = vsyncpa [#allocation3], 0  ;;  %s2405_s0 = inlined_call_operand.vmem [shape: f32[2,8,32], index: 0, kind: input, shape index: {}]   ;;  %s2406_s1 = inlined_call_operand.hbm [shape: f32[2,1,8], index: 1, kind: input, shape index: {}]   ;;  %s2407_s2 = inlined_call_operand.vmem [shape: bf16[32,96], index: 2, kind: input, shape index: {}]   ;;  %s2408_s3 = inlined_call_operand.hbm [shape: f32[1,96], index: 3, kind: input, shape index: {}]   ;;  %s2409_s4 = inlined_call_operand.vmem [shape: bf16[32,32], index: 4, kind: input, shape index: {}]   ;;  %s2410_s5 = inlined_call_operand.hbm [shape: f32[1,32], index: 5, kind: input, shape index: {}]   ;;  %s2411_s6 = inlined_call_operand.hbm [shape: f32[1,32], index: 6, kind: input, shape index: {}]   ;;  %s2412_s7 = inlined_call_operand.hbm [shape: f32[1,32], index: 7, kind: input, shape index: {}]   ;;  %s2413_s8 = inlined_call_operand.hbm [shape: f32[1,32], index: 8, kind: input, shape index: {}]   ;;  %s2414_s9 = inlined_call_operand.hbm [shape: f32[1,32], index: 9, kind: input, shape index: {}]   ;;  %s2415_s10 = inlined_call_operand.vmem [shape: bf16[32,64], index: 10, kind: input, shape index: {}]   ;;  %s2416_s11 = inlined_call_operand.vmem [shape: f32[1,64], index: 11, kind: input, shape index: {}]   ;;  %s2417_s12 = inlined_call_operand.vmem [shape: bf16[64,32], index: 12, kind: input, shape index: {}]   ;;  %s2418_s13 = inlined_call_operand.vmem [shape: f32[1,32], index: 13, kind: input, shape index: {}]   ;;  %s2419_s14 = inlined_call_operand.hbm [shape: f32[2,8,32], index: 14, kind: output, shape index: {}]  }
   0x1   :  { %20 = vsyncpa [#allocation6], 0 }
   0x2   :  { %21 = vsyncpa [#allocation9], 0 }
   0x3   :  { %22 = vsyncpa [#allocation12], 0 }
   0x4   :  { %23 = vsyncpa [#allocation4], 0  ;;  %s1986_s29 = smov [#allocation5]   ;;  %s1987_s15 = smov [#allocation8]  }
   0x5   :  { %s46_s30 = sshll.u32 %s1986_s29, 4  ;;  %s68_s16 = sshll.u32 %s1987_s15, 4  ;;  %s47_s30 = int_to_ptr.vmem [resolvable:$true] %s46_s30  ;;  %s69_s16 = int_to_ptr.vmem [resolvable:$true] %s68_s16 }
   0x6   :  { %s1824_s17 = scalar_lea.vmem %s47_s30, 16  ;;  %s1828_s18 = scalar_lea.vmem %s47_s30, 32 }
   0x7   :  { %p1825_p0 = scmp.ne.s32.totalorder %s47_s30, %s1824_s17  ;;  %p1829_p1 = scmp.lt.s32.totalorder %s47_s30, %s47_s30 }
   0x8   :  { %p1830_p2 = scmp.lt.s32.totalorder %s1828_s18, %s1824_s17 }
   0xa   :  { %p1831_p3 = por %p1830_p2, %p1829_p1 }
   0xc   :  { %p1832_p4 = pnand %p1831_p3, %p1825_p0 }
   0xe   :  { %1835 = shalt.err (!%p1832_p4)
}
   0xf   :  { %49 = dma.hbm_to_vmem [thread:$0]  %s2408_s3, 16, %s47_s30, [#allocation6]  }
  0x10   :  { %s1844_s21 = scalar_lea.vmem %s69_s16, 16  ;;  %s1848_s22 = scalar_lea.vmem %s69_s16, 32 }
  0x11   :  { %p1845_p5 = scmp.ne.s32.totalorder %s69_s16, %s1844_s21  ;;  %p1849_p6 = scmp.lt.s32.totalorder %s69_s16, %s69_s16 }
  0x12   :  { %p1850_p7 = scmp.lt.s32.totalorder %s1848_s22, %s1844_s21 }
  0x14   :  { %p1851_p8 = por %p1850_p7, %p1849_p6 }
  0x16   :  { %p1852_p9 = pnand %p1851_p8, %p1845_p5 }
  0x18   :  { %1855 = shalt.err (!%p1852_p9)
}
  0x19   :  { %71 = dma.hbm_to_vmem [thread:$0]  %s2411_s6, 16, %s69_s16, [#allocation9]  }
  0x1a   :  { %s1988_s25 = smov [#allocation11]   ;;  %s1989_s27 = smov [#allocation2]  }
  0x1b   :  { %s88_s26 = sshll.u32 %s1988_s25, 4  ;;  %s31_s28 = sshll.u32 %s1989_s27, 4  ;;  %s89_s26 = int_to_ptr.vmem [resolvable:$true] %s88_s26  ;;  %s32_s28 = int_to_ptr.vmem [resolvable:$true] %s31_s28 }
  0x1c   :  { %s1864_s29 = scalar_lea.vmem %s89_s26, 16  ;;  %s1868_s3 = scalar_lea.vmem %s89_s26, 32 }
  0x1d   :  { %p1865_p10 = scmp.ne.s32.totalorder %s89_s26, %s1864_s29  ;;  %p1869_p11 = scmp.lt.s32.totalorder %s89_s26, %s89_s26 }
  0x1e   :  { %p1870_p12 = scmp.lt.s32.totalorder %s1868_s3, %s1864_s29 }
  0x20   :  { %p1871_p13 = por %p1870_p12, %p1869_p11 }
  0x22   :  { %p1872_p0 = pnand %p1871_p13, %p1865_p10 }
  0x24   :  { %1875 = shalt.err (!%p1872_p0)
}
  0x25   :  { %91 = dma.hbm_to_vmem [thread:$0]  %s2413_s8, 16, %s89_s26, [#allocation12]  }
  0x26   :  { %s1884_s17 = scalar_lea.vmem %s32_s28, 32  ;;  %p1889_p2 = scmp.lt.s32.totalorder %s32_s28, %s32_s28 }
  0x27   :  { %p1885_p1 = scmp.ne.s32.totalorder %s32_s28, %s1884_s17  ;;  %p1890_p3 = scmp.lt.s32.totalorder %s1884_s17, %s1884_s17 }
  0x29   :  { %p1891_p4 = por %p1890_p3, %p1889_p2 }
  0x2b   :  { %p1892_p5 = pnand %p1891_p4, %p1885_p1 }
  0x2d   :  { %1895 = shalt.err (!%p1892_p5)
}
  0x2e   :  { %s1990_s6 = smov 16   ;;  %s1991_s16 = smov 1  }
  0x2f   :  { %37 = dma.hbm_to_vmem [thread:$0]  %s2406_s1, 32, %s32_s28, [#allocation3], %s1990_s6, %s1990_s6, %s1991_s16  }
  0x30   :  { %s1992_s20 = smov [#allocation7]   ;;  %s1993_s22 = smov [#allocation10]  }
  0x31   :  { %s58_s21 = sshll.u32 %s1992_s20, 4  ;;  %s78_s23 = sshll.u32 %s1993_s22, 4  ;;  %s59_s21 = int_to_ptr.vmem [resolvable:$true] %s58_s21  ;;  %s79_s23 = int_to_ptr.vmem [resolvable:$true] %s78_s23 }
  0x32   :  { %s1904_s8 = scalar_lea.vmem %s59_s21, 16  ;;  %s1908_s24 = scalar_lea.vmem %s59_s21, 32 }
  0x33   :  { %p1905_p6 = scmp.ne.s32.totalorder %s59_s21, %s1904_s8  ;;  %p1909_p7 = scmp.lt.s32.totalorder %s59_s21, %s59_s21 }
  0x34   :  { %p1910_p8 = scmp.lt.s32.totalorder %s1908_s24, %s1904_s8 }
  0x36   :  { %p1911_p9 = por %p1910_p8, %p1909_p7 }
  0x38   :  { %p1912_p10 = pnand %p1911_p9, %p1905_p6 }
  0x3a   :  { %1915 = shalt.err (!%p1912_p10)
}
  0x3b   :  { %61 = dma.hbm_to_vmem [thread:$0]  %s2410_s5, 16, %s59_s21, [#allocation6]  }
  0x3c   :  { %s1924_s27 = scalar_lea.vmem %s79_s23, 16  ;;  %s1928_s1 = scalar_lea.vmem %s79_s23, 32 }
  0x3d   :  { %p1925_p11 = scmp.ne.s32.totalorder %s79_s23, %s1924_s27  ;;  %p1929_p12 = scmp.lt.s32.totalorder %s79_s23, %s79_s23 }
  0x3e   :  { %p1930_p13 = scmp.lt.s32.totalorder %s1928_s1, %s1924_s27 }
  0x40   :  { %p1931_p0 = por %p1930_p13, %p1929_p12 }
  0x42   :  { %p1932_p1 = pnand %p1931_p0, %p1925_p11 }
  0x44   :  { %1935 = shalt.err (!%p1932_p1)
}
  0x45   :  { %81 = dma.hbm_to_vmem [thread:$0]  %s2412_s7, 16, %s79_s23, [#allocation9]  }
  0x46   :  { %s1994_s3 = smov [#allocation13]  }
  0x47   :  { %s98_s30 = sshll.u32 %s1994_s3, 4  ;;  %s99_s30 = int_to_ptr.vmem [resolvable:$true] %s98_s30 }
  0x48   :  { %s1944_s15 = scalar_lea.vmem %s99_s30, 16  ;;  %s1948_s17 = scalar_lea.vmem %s99_s30, 32 }
  0x49   :  { %p1945_p2 = scmp.ne.s32.totalorder %s99_s30, %s1944_s15  ;;  %p1949_p3 = scmp.lt.s32.totalorder %s99_s30, %s99_s30 }
  0x4a   :  { %p1950_p4 = scmp.lt.s32.totalorder %s1948_s17, %s1944_s15 }
  0x4c   :  { %p1951_p5 = por %p1950_p4, %p1949_p3 }
  0x4e   :  { %p1952_p6 = pnand %p1951_p5, %p1945_p2 }
  0x50   :  { %1955 = shalt.err (!%p1952_p6)
}
  0x51   :  { %101 = dma.hbm_to_vmem [thread:$0]  %s2414_s9, 16, %s99_s30, [#allocation12]  }
  0x52   :  { %1976 = dma.done.wait [#allocation3], 32  }
  0x53   :  { %1977 = vsyncadd [#allocation3], 4294967264 }
  0x54   :  { %1978 = dma.done.wait [#allocation6], 32  }
  0x55   :  { %1979 = vsyncadd [#allocation6], 4294967264 }
  0x56   :  { %1980 = dma.done.wait [#allocation9], 32  }
  0x57   :  { %1981 = vsyncadd [#allocation9], 4294967264 }
  0x58   :  { %1982 = dma.done.wait [#allocation12], 32  }
  0x59   :  { %1983 = vsyncadd [#allocation12], 4294967264  ;;  %vm138_vm0 = vcmask 261120   ;;  %v2107_v0 = vld [vmem:[%s2405_s0] sm:$0xff]  ;;  %v2112_v1 = vld [vmem:[%s2405_s0 + $0x8] sm:$0xff]  ;;  %v1995_v15 = vmov 0.0  }
  0x5a   :  { %v139_v2 = vsel %vm138_vm0, %v2107_v0, 0.0  ;;  %v142_v3 = vsel %vm138_vm0, %v2112_v1, 0.0  ;;  %v1762_v14 = vld [vmem:[%s2407_s2 + $0x8] sm:$0xff]   ;;  %1595 = vmatprep.subr.bf16.mxu0 %v1995_v15  ;;  %vm1996_vm1 = vmmov 0   ;;  %v1763_v16 = vld [vmem:[%s2407_s2] sm:$0xff]   ;;  %1603 = vmatprep.subr.bf16.mxu1 %v1995_v15  ;;  %s1997_s2 = smov 120  }
  0x5b   :  { %140 = vadd.xlane.f32.xlu0 %v139_v2  ;;  %1599 = vmatprep.mubr.msk.bf16.mxu0 %vm1996_vm1, %v1995_v15  ;;  %v1499_v25 = vld [vmem:[#allocation8] ss:$0 sm:$0xff]  ;;  %v1500_v29 = vld [vmem:[#allocation10] ss:$0 sm:$0xff]  ;;  %v1501_v34 = vld [vmem:[#allocation5] ss:$0 sm:$0xff] }
  0x5c   :  { %1596 = vmatpush3.bf16.msra.mxu0 %v1762_v14  ;;  %1605 = vmatprep.mubr.msk.bf16.mxu1 %vm1996_vm1, %v1995_v15  ;;  %s1998_s23 = smov 104   ;;  %s1999_s8 = smov 96   ;;  %vm270_vm2 = vcmask 64512   ;;  %vm786_vm3 = vcmask 1043456   ;;  %vm1192_vm4 = vcmask 130048   ;;  %vm1195_vm5 = vcmask 195584  }
  0x5d   :  { %1597 = vmatprep.subr.bf16.mxu0 %v1995_v15  ;;  %s2000_s24 = smov 112   ;;  %s2001_s25 = smov 64   ;;  %vm1430_vm6 = vcmask 523264  }
  0x5e   :  { %s2002_s26 = smov 8   ;;  %s2003_s3 = smov 24  }
  0x5f   :  { %143 = vadd.xlane.f32.xlu0 %v142_v3  ;;  %s2004_s21 = smov [#allocation14]  }
  0x60   :  { %1598 = vmatpush3.bf16.msra.mxu0 %v1763_v16  ;;  %s1484_s22 = sshll.u32 %s2004_s21, 4  ;;  %s1485_s22 = int_to_ptr.vmem [resolvable:$true] %s1484_s22 }
  0x61   :  { %1609 = vmatprep.subr.bf16.mxu0 %v1995_v15  ;;  %p1961_p8 = scmp.lt.s32.totalorder %s1485_s22, %s1485_s22 }
  0xe4   :  { %v141_v4 = vpop.xlane.xlu0 %140 }
  0xe5   :  { %v146_v5 = vmul.f32 0.03125, %v141_v4 }
  0xe7   :  { %v148_v6 = vsub.f32 %v2107_v0, %v146_v5 }
  0xe8   :  { %v144_v7 = vpop.xlane.xlu0 %143 }
  0xe9   :  { %v147_v8 = vmul.f32 0.03125, %v144_v7  ;;  %v150_v9 = vmul.f32 %v148_v6, %v148_v6 }
  0xeb   :  { %v149_v10 = vsub.f32 %v2112_v1, %v147_v8  ;;  %v152_v11 = vsel %vm138_vm0, %v150_v9, 0.0  ;;  %v1521_v9 = vld [vmem:[#allocation2] ss:$0 sm:$0xff] }
  0xec   :  { %153 = vadd.xlane.f32.xlu1 %v152_v11 }
  0xed   :  { %v151_v12 = vmul.f32 %v149_v10, %v149_v10 }
  0xef   :  { %v155_v13 = vsel %vm138_vm0, %v151_v12, 0.0 }
  0xf0   :  { %156 = vadd.xlane.f32.xlu1 %v155_v13 }
 0x175   :  { %v154_v17 = vpop.xlane.xlu1 %153 }
 0x176   :  { %v158_v18 = vmul.f32 0.03125, %v154_v17  ;;  %v1522_v17 = vld [vmem:[#allocation2 + $0x1] ss:$0 sm:$0xff] }
 0x178   :  { %v160_v19 = vadd.f32 1e-05, %v158_v18 }
 0x179   :  { %v157_v20 = vpop.xlane.xlu1 %156 }
 0x17a   :  { %1772 = vrsqrt.f32 %v160_v19  ;;  %v159_v21 = vmul.f32 0.03125, %v157_v20 }
 0x17c   :  { %v161_v22 = vadd.f32 1e-05, %v159_v21 }
 0x17e   :  { %1774 = vrsqrt.f32 %v161_v22 }
 0x187   :  { %v1773_v23 = vpop.eup %1772 }
 0x188   :  { %v164_v24 = vmul.f32 %v1773_v23, %v148_v6 }
 0x18a   :  { %v172_v28 = vmul.f32 %v1499_v25, %v164_v24 }
 0x18b   :  { %v1775_v26 = vpop.eup %1774 }
 0x18c   :  { %v165_v27 = vmul.f32 %v1775_v26, %v149_v10  ;;  %v180_v31 = vadd.f32 %v1500_v29, %v172_v28 }
 0x18e   :  { %v173_v30 = vmul.f32 %v1499_v25, %v165_v27 }
 0x190   :  { %v181_v32 = vadd.f32 %v1500_v29, %v173_v30 }
 0x192   :  { %v182_v33 = vpack.c.bf16 %v181_v32, %v180_v31 }
 0x194   :  { %1600 = vmatmul.mubr.msk.bf16.vlgmr.msra.gmra.mxu0 %vm138_vm0, %v182_v33 }
 0x195   :  { %1611 = vmatprep.mubr.msk.bf16.mxu0 %vm1996_vm1, %v1995_v15 }
 0x254   :  { %v243_v35 = vpop.f32.mrf.mxu0 }
 0x255   :  { %v244_v36 = vadd.f32 %v1501_v34, %v243_v35 }
 0x256   :  { %v1601_v37 = vpop.f32.mrf.mxu0 }
 0x257   :  { %v2139_v38 = vpack.c.bf16 %v244_v36, %v244_v36 }
 0x258   :  { %v246_v39 = vpop.f32.mrf.mxu0 }
 0x259   :  { %v247_v40 = vadd.f32 %v1501_v34, %v246_v39  ;;  %256 = vrot.lane.b32.xlu0 %v2139_v38, %s1997_s2 }
 0x25a   :  { %v1602_v41 = vpop.f32.mrf.mxu0 }
 0x25b   :  { %v2142_v42 = vpack.c.bf16 %v247_v40, %v247_v40 }
 0x25d   :  { %264 = vrot.lane.b32.xlu0 %v2139_v38, %s1998_s23  ;;  %258 = vrot.lane.b32.xlu1 %v2142_v42, %s1997_s2  ;;  %s1956_s2 = scalar_lea.vmem %s1485_s22, 256 }
 0x25e   :  { %p1957_p7 = scmp.ne.s32.totalorder %s1485_s22, %s1956_s2  ;;  %p1962_p9 = scmp.lt.s32.totalorder %s1956_s2, %s1956_s2 }
 0x260   :  { %p1963_p10 = por %p1962_p9, %p1961_p8 }
 0x261   :  { %268 = vrot.lane.b32.xlu0 %v2139_v38, %s1999_s8  ;;  %260 = vrot.lane.b32.xlu1 %v2139_v38, %s2000_s24 }
 0x262   :  { %p1964_p11 = pnand %p1963_p10, %p1957_p7 }
 0x265   :  { %262 = vrot.lane.b32.xlu1 %v2142_v42, %s2000_s24 }
 0x269   :  { %266 = vrot.lane.b32.xlu1 %v2142_v42, %s1998_s23 }
 0x26d   :  { %317 = vrot.lane.b32.xlu1 %v2142_v42, %s1999_s8 }
 0x2cb   :  { %v257_v43 = vpop.permute.xlu0 %256 }
 0x2cc   :  { %v2153_v44 = vcombine.low %v257_v43, %v257_v43 }
 0x2ce   :  { %367 = vrot.lane.b32.xlu0 %v2153_v44, %s1999_s8 }
 0x2cf   :  { %v265_v45 = vpop.permute.xlu0 %264  ;;  %v259_v46 = vpop.permute.xlu1 %258 }
 0x2d0   :  { %v2157_v47 = vcombine.low %v259_v46, %v259_v46  ;;  %v2167_v53 = vcombine.low %v265_v45, %v265_v45 }
 0x2d2   :  { %417 = vrot.lane.b32.xlu1 %v2157_v47, %s1999_s8 }
 0x2d3   :  { %v269_v48 = vpop.permute.xlu0 %268  ;;  %v261_v49 = vpop.permute.xlu1 %260 }
 0x2d4   :  { %v2161_v50 = vcombine.low %v261_v49, %v261_v49  ;;  %v275_v51 = vsel %vm270_vm2, %v269_v48, 0 }
 0x2d5   :  { %1604 = vmatpush3.bf16.xpose.msra.mxu1 %v275_v51 }
 0x2d6   :  { %467 = vrot.lane.b32.xlu0 %v2161_v50, %s1999_s8  ;;  %1615 = vmatprep.subr.bf16.mxu1 %v1995_v15 }
 0x2d7   :  { %v263_v52 = vpop.permute.xlu1 %262 }
 0x2d8   :  { %v2169_v54 = vcombine.low %v263_v52, %v263_v52 }
 0x2da   :  { %567 = vrot.lane.b32.xlu0 %v2167_v53, %s1999_s8  ;;  %517 = vrot.lane.b32.xlu1 %v2169_v54, %s1999_s8 }
 0x2db   :  { %v267_v55 = vpop.permute.xlu1 %266 }
 0x2dc   :  { %v2175_v56 = vcombine.low %v267_v55, %v267_v55  ;;  %1606 = vmatmul.mubr.msk.bf16.vlgmr.msra.gmra.mxu1 %vm270_vm2, %v2139_v38 }
 0x2dd   :  { %1617 = vmatprep.mubr.msk.bf16.mxu1 %vm1996_vm1, %v1995_v15 }
 0x2de   :  { %617 = vrot.lane.b32.xlu1 %v2175_v56, %s1999_s8 }
 0x2df   :  { %v318_v57 = vpop.permute.xlu1 %317 }
 0x2e0   :  { %v323_v58 = vsel %vm270_vm2, %v318_v57, 0 }
 0x2e1   :  { %1610 = vmatpush3.bf16.xpose.msra.mxu0 %v323_v58 }
 0x2e2   :  { %1621 = vmatprep.subr.bf16.mxu0 %v1995_v15 }
 0x2e8   :  { %1612 = vmatmul.mubr.msk.bf16.vlgmr.msra.gmra.mxu0 %vm270_vm2, %v2142_v42 }
 0x2e9   :  { %1623 = vmatprep.mubr.msk.bf16.mxu0 %vm1996_vm1, %v1995_v15 }
 0x340   :  { %v368_v59 = vpop.permute.xlu0 %367 }
 0x341   :  { %v373_v60 = vsel %vm270_vm2, %v368_v59, 0 }
 0x342   :  { %1616 = vmatpush3.bf16.xpose.msra.mxu1 %v373_v60 }
 0x343   :  { %1627 = vmatprep.subr.bf16.mxu1 %v1995_v15 }
 0x344   :  { %v418_v61 = vpop.permute.xlu1 %417 }
 0x345   :  { %v423_v62 = vsel %vm270_vm2, %v418_v61, 0 }
 0x346   :  { %1622 = vmatpush3.bf16.xpose.msra.mxu0 %v423_v62 }
 0x347   :  { %1633 = vmatprep.subr.bf16.mxu0 %v1995_v15 }
 0x348   :  { %v468_v63 = vpop.permute.xlu0 %467 }
 0x349   :  { %v473_v2 = vsel %vm270_vm2, %v468_v63, 0  ;;  %1618 = vmatmul.mubr.msk.bf16.vlgmr.msra.gmra.mxu1 %vm270_vm2, %v257_v43 }
 0x34a   :  { %1628 = vmatpush3.bf16.xpose.msra.mxu1 %v473_v2  ;;  %1629 = vmatprep.mubr.msk.bf16.mxu1 %vm1996_vm1, %v1995_v15 }
 0x34b   :  { %1639 = vmatprep.subr.bf16.mxu1 %v1995_v15 }
 0x34c   :  { %v518_v3 = vpop.permute.xlu1 %517  ;;  %v568_v5 = vpop.permute.xlu0 %567 }
 0x34d   :  { %v523_v4 = vsel %vm270_vm2, %v518_v3, 0  ;;  %1624 = vmatmul.mubr.msk.bf16.vlgmr.msra.gmra.mxu0 %vm270_vm2, %v259_v46  ;;  %v573_v6 = vsel %vm270_vm2, %v568_v5, 0 }
 0x34e   :  { %1634 = vmatpush3.bf16.xpose.msra.mxu0 %v523_v4  ;;  %1635 = vmatprep.mubr.msk.bf16.mxu0 %vm1996_vm1, %v1995_v15 }
 0x34f   :  { %1645 = vmatprep.subr.bf16.mxu0 %v1995_v15 }
 0x350   :  { %v618_v7 = vpop.permute.xlu1 %617 }
 0x351   :  { %1630 = vmatmul.mubr.msk.bf16.vlgmr.msra.gmra.mxu1 %vm270_vm2, %v261_v49  ;;  %v623_v8 = vsel %vm270_vm2, %v618_v7, 0 }
 0x352   :  { %1640 = vmatpush3.bf16.xpose.msra.mxu1 %v573_v6  ;;  %1641 = vmatprep.mubr.msk.bf16.mxu1 %vm1996_vm1, %v1995_v15 }
 0x353   :  { %1651 = vmatprep.subr.bf16.mxu1 %v1995_v15 }
 0x355   :  { %1636 = vmatmul.mubr.msk.bf16.vlgmr.msra.gmra.mxu0 %vm270_vm2, %v263_v52 }
 0x356   :  { %1646 = vmatpush3.bf16.xpose.msra.mxu0 %v623_v8  ;;  %1647 = vmatprep.mubr.msk.bf16.mxu0 %vm1996_vm1, %v1995_v15 }
 0x357   :  { %1657 = vmatprep.subr.bf16.mxu0 %v1995_v15 }
 0x359   :  { %1642 = vmatmul.mubr.msk.bf16.vlgmr.msra.gmra.mxu1 %vm270_vm2, %v265_v45 }
 0x35a   :  { %1653 = vmatprep.mubr.msk.bf16.mxu1 %vm1996_vm1, %v1995_v15 }
 0x35d   :  { %1648 = vmatmul.mubr.msk.bf16.vlgmr.msra.gmra.mxu0 %vm270_vm2, %v267_v55 }
 0x35e   :  { %1659 = vmatprep.mubr.msk.bf16.mxu0 %vm1996_vm1, %v1995_v15 }
 0x39c   :  { %v311_v10 = vpop.f32.mrf.mxu1 }
 0x39d   :  { %v677_v11 = vadd.f32 %v1521_v9, %v311_v10 }
 0x39e   :  { %v1607_v12 = vpop.f32.mrf.mxu1 }
 0x39f   :  { %v685_v13 = vsel %vm270_vm2, %v677_v11, -inf }
 0x3a0   :  { %v314_v14 = vpop.f32.mrf.mxu1  ;;  %686 = vmax.xlane.f32.xlu0 %v685_v13 }
 0x3a2   :  { %v1608_v16 = vpop.f32.mrf.mxu1 }
 0x3a8   :  { %v359_v18 = vpop.f32.mrf.mxu0 }
 0x3a9   :  { %v678_v19 = vadd.f32 %v1522_v17, %v359_v18 }
 0x3aa   :  { %v1613_v20 = vpop.f32.mrf.mxu0 }
 0x3ab   :  { %v688_v21 = vsel %vm270_vm2, %v678_v19, -inf }
 0x3ac   :  { %689 = vmax.xlane.f32.xlu1 %v688_v21  ;;  %v362_v22 = vpop.f32.mrf.mxu0 }
 0x3ae   :  { %v1614_v23 = vpop.f32.mrf.mxu0 }
 0x409   :  { %v409_v24 = vpop.f32.mrf.mxu1 }
 0x40a   :  { %v2221_v25 = vadd.f32 %v1521_v9, %v409_v24 }
 0x40b   :  { %v1619_v26 = vpop.f32.mrf.mxu1 }
 0x40c   :  { %v691_v27 = vsel %vm270_vm2, %v2221_v25, -inf }
 0x40d   :  { %v412_v28 = vpop.f32.mrf.mxu1  ;;  %692 = vmax.xlane.f32.xlu0 %v691_v27  ;;  %v459_v29 = vpop.f32.mrf.mxu0 }
 0x40e   :  { %v2225_v30 = vadd.f32 %v1522_v17, %v459_v29 }
 0x40f   :  { %v1620_v31 = vpop.f32.mrf.mxu1  ;;  %v1625_v32 = vpop.f32.mrf.mxu0 }
 0x410   :  { %v694_v33 = vsel %vm270_vm2, %v2225_v30, -inf }
 0x411   :  { %v509_v34 = vpop.f32.mrf.mxu1  ;;  %695 = vmax.xlane.f32.xlu0 %v694_v33  ;;  %v462_v35 = vpop.f32.mrf.mxu0 }
 0x412   :  { %v2229_v36 = vadd.f32 %v1521_v9, %v509_v34 }
 0x413   :  { %v1626_v37 = vpop.f32.mrf.mxu0  ;;  %v1631_v39 = vpop.f32.mrf.mxu1 }
 0x414   :  { %v697_v40 = vsel %vm270_vm2, %v2229_v36, -inf }
 0x415   :  { %v512_v41 = vpop.f32.mrf.mxu1  ;;  %698 = vmax.xlane.f32.xlu0 %v697_v40  ;;  %v559_v43 = vpop.f32.mrf.mxu0 }
 0x416   :  { %v682_v45 = vadd.f32 %v1522_v17, %v559_v43 }
 0x417   :  { %v1632_v46 = vpop.f32.mrf.mxu1  ;;  %v1637_v48 = vpop.f32.mrf.mxu0 }
 0x418   :  { %v700_v49 = vsel %vm270_vm2, %v682_v45, -inf }
 0x419   :  { %v609_v51 = vpop.f32.mrf.mxu1  ;;  %701 = vmax.xlane.f32.xlu1 %v700_v49  ;;  %v562_v52 = vpop.f32.mrf.mxu0 }
 0x41a   :  { %v2234_v55 = vadd.f32 %v1521_v9, %v609_v51 }
 0x41b   :  { %v1638_v57 = vpop.f32.mrf.mxu0  ;;  %v1643_v58 = vpop.f32.mrf.mxu1 }
 0x41c   :  { %v703_v59 = vsel %vm270_vm2, %v2234_v55, -inf }
 0x41d   :  { %v612_v60 = vpop.f32.mrf.mxu1  ;;  %704 = vmax.xlane.f32.xlu0 %v703_v59  ;;  %v659_v61 = vpop.f32.mrf.mxu0 }
 0x41e   :  { %v684_v7 = vadd.f32 %v1522_v17, %v659_v61 }
 0x41f   :  { %v1644_v62 = vpop.f32.mrf.mxu1  ;;  %v1649_v63 = vpop.f32.mrf.mxu0 }
 0x420   :  { %v706_v10 = vsel %vm270_vm2, %v684_v7, -inf }
 0x421   :  { %v662_v2 = vpop.f32.mrf.mxu0 }
 0x423   :  { %v1650_v3 = vpop.f32.mrf.mxu0 }
 0x429   :  { %v687_v4 = vpop.xlane.xlu0 %686 }
 0x42a   :  { %830 = vrot.lane.b32.xlu1 %v2142_v42, %s2001_s25  ;;  %v709_v5 = vsub.f32 %v677_v11, %v687_v4 }
 0x42c   :  { %v717_v6 = vmul.f32 1.442695, %v709_v5 }
 0x42e   :  { %878 = vrot.lane.b32.xlu1 %v2153_v44, %s2001_s25  ;;  %1776 = vpow2.f32 %v717_v6 }
 0x433   :  { %781 = vrot.lane.b32.xlu0 %v2139_v38, %s2001_s25 }
 0x435   :  { %v690_v42 = vpop.xlane.xlu1 %689 }
 0x436   :  { %v710_v44 = vsub.f32 %v678_v19, %v690_v42 }
 0x438   :  { %v719_v38 = vmul.f32 1.442695, %v710_v44 }
 0x43a   :  { %1778 = vpow2.f32 %v719_v38 }
 0x43b   :  { %v2244_v8 = vpop.eup %1776 }
 0x43c   :  { %v733_v9 = vsel %vm270_vm2, %v2244_v8, 0.0 }
 0x447   :  { %v2251_v11 = vpop.eup %1778 }
 0x448   :  { %v736_v12 = vsel %vm270_vm2, %v2251_v11, 0.0 }
 0x452   :  { %734 = vadd.xlane.f32.xlu0 %v733_v9  ;;  %707 = vmax.xlane.f32.xlu1 %v706_v10 }
 0x463   :  { %926 = vrot.lane.b32.xlu1 %v2157_v47, %s2001_s25 }
 0x487   :  { %737 = vadd.xlane.f32.xlu1 %v736_v12 }
 0x496   :  { %v693_v13 = vpop.xlane.xlu0 %692 }
 0x497   :  { %v711_v14 = vsub.f32 %v2221_v25, %v693_v13 }
 0x498   :  { %1022 = vrot.lane.b32.xlu1 %v2169_v54, %s2001_s25 }
 0x499   :  { %v721_v16 = vmul.f32 1.442695, %v711_v14 }
 0x49a   :  { %v696_v17 = vpop.xlane.xlu0 %695 }
 0x49b   :  { %1780 = vpow2.f32 %v721_v16  ;;  %v712_v19 = vsub.f32 %v2225_v30, %v696_v17 }
 0x49d   :  { %v723_v22 = vmul.f32 1.442695, %v712_v19 }
 0x49e   :  { %v699_v47 = vpop.xlane.xlu0 %698 }
 0x49f   :  { %1782 = vpow2.f32 %v723_v22  ;;  %v713_v33 = vsub.f32 %v2229_v36, %v699_v47 }
 0x4a1   :  { %v725_v34 = vmul.f32 1.442695, %v713_v33 }
 0x4a2   :  { %v702_v18 = vpop.xlane.xlu1 %701 }
 0x4a3   :  { %v714_v23 = vsub.f32 %v682_v45, %v702_v18 }
 0x4a5   :  { %v727_v27 = vmul.f32 1.442695, %v714_v23 }
 0x4a6   :  { %v705_v20 = vpop.xlane.xlu0 %704  ;;  %v831_v21 = vpop.permute.xlu1 %830 }
 0x4a7   :  { %v836_v24 = vsel %vm786_vm3, %v831_v21, 0  ;;  %1784 = vpow2.f32 %v727_v27  ;;  %v715_v35 = vsub.f32 %v2234_v55, %v705_v20 }
 0x4a8   :  { %v2260_v26 = vpop.eup %1780  ;;  %1658 = vmatpush3.bf16.msra.mxu0 %v836_v24  ;;  %1786 = vpow2.f32 %v725_v34 }
 0x4a9   :  { %v739_v54 = vsel %vm270_vm2, %v2260_v26, 0.0  ;;  %1669 = vmatprep.subr.bf16.mxu0 %v1995_v15  ;;  %v729_v37 = vmul.f32 1.442695, %v715_v35 }
 0x4aa   :  { %740 = vadd.xlane.f32.xlu0 %v739_v54  ;;  %v782_v25 = vpop.permute.xlu0 %781  ;;  %v879_v39 = vpop.permute.xlu1 %878 }
 0x4ab   :  { %v788_v28 = vsel %vm786_vm3, %v782_v25, 0  ;;  %1788 = vpow2.f32 %v729_v37  ;;  %v884_v57 = vsel %vm786_vm3, %v879_v39, 0 }
 0x4ac   :  { %1652 = vmatpush3.bf16.msra.mxu1 %v788_v28  ;;  %v2267_v29 = vpop.eup %1782 }
 0x4ad   :  { %1663 = vmatprep.subr.bf16.mxu1 %v1995_v15  ;;  %v742_v30 = vsel %vm270_vm2, %v2267_v29, 0.0 }
 0x4b4   :  { %v2271_v31 = vpop.eup %1784 }
 0x4b5   :  { %v748_v32 = vsel %vm270_vm2, %v2271_v31, 0.0  ;;  %v2279_v40 = vpop.eup %1786 }
 0x4b8   :  { %v2283_v48 = vpop.eup %1788 }
 0x4b9   :  { %v751_v36 = vsel %vm270_vm2, %v2283_v48, 0.0 }
 0x4bc   :  { %743 = vadd.xlane.f32.xlu1 %v742_v30 }
 0x4c0   :  { %974 = vrot.lane.b32.xlu0 %v2161_v50, %s2001_s25  ;;  %749 = vadd.xlane.f32.xlu1 %v748_v32  ;;  %v745_v50 = vsel %vm270_vm2, %v2279_v40, 0.0 }
 0x4db   :  { %v735_v41 = vpop.xlane.xlu0 %734  ;;  %v708_v43 = vpop.xlane.xlu1 %707 }
 0x4dc   :  { %1790 = vrcp.f32 %v735_v41  ;;  %v716_v45 = vsub.f32 %v684_v7, %v708_v43 }
 0x4de   :  { %v731_v46 = vmul.f32 1.442695, %v716_v45 }
 0x4df   :  { %746 = vadd.xlane.f32.xlu0 %v745_v50  ;;  %v927_v59 = vpop.permute.xlu1 %926 }
 0x4e0   :  { %1792 = vpow2.f32 %v731_v46  ;;  %v932_v2 = vsel %vm786_vm3, %v927_v59, 0 }
 0x4e3   :  { %752 = vadd.xlane.f32.xlu0 %v751_v36 }
 0x4e9   :  { %v1791_v49 = vpop.eup %1790 }
 0x4ea   :  { %v765_v51 = vmul.f32 %v1791_v49, %v2244_v8 }
 0x4ec   :  { %v773_v52 = vpack.c.bf16 %v765_v51, %v765_v51 }
 0x4ed   :  { %v2288_v55 = vpop.eup %1792 }
 0x4ee   :  { %1654 = vmatmul.mubr.msk.bf16.vlgmr.msra.gmra.mxu1 %vm270_vm2, %v773_v52  ;;  %v754_v58 = vsel %vm270_vm2, %v2288_v55, 0.0 }
 0x4ef   :  { %1664 = vmatpush3.bf16.msra.mxu1 %v884_v57  ;;  %755 = vadd.xlane.f32.xlu1 %v754_v58  ;;  %v1764_v57 = vld [vmem:[%s2409_s4 + $0x8] sm:$0xff]  }
 0x4f0   :  { %1665 = vmatprep.mubr.msk.bf16.mxu1 %vm1996_vm1, %v1995_v15  ;;  %1675 = vmatprep.subr.bf16.mxu1 %v1995_v15 }
 0x4f9   :  { %1070 = vrot.lane.b32.xlu0 %v2167_v53, %s2001_s25 }
 0x500   :  { %1118 = vrot.lane.b32.xlu1 %v2175_v56, %s2001_s25 }
 0x510   :  { %v738_v60 = vpop.xlane.xlu1 %737 }
 0x511   :  { %1794 = vrcp.f32 %v738_v60 }
 0x514   :  { %v1023_v3 = vpop.permute.xlu1 %1022 }
 0x51e   :  { %v1795_v61 = vpop.eup %1794 }
 0x51f   :  { %v766_v62 = vmul.f32 %v1795_v61, %v2251_v11  ;;  %v1028_v11 = vsel %vm786_vm3, %v1023_v3, 0 }
 0x521   :  { %v774_v63 = vpack.c.bf16 %v766_v62, %v766_v62 }
 0x523   :  { %1660 = vmatmul.mubr.msk.bf16.vlgmr.msra.gmra.mxu0 %vm270_vm2, %v774_v63  ;;  %v1765_v63 = vld [vmem:[%s2409_s4] sm:$0xff]  }
 0x524   :  { %1670 = vmatpush3.bf16.msra.mxu0 %v932_v2  ;;  %1671 = vmatprep.mubr.msk.bf16.mxu0 %vm1996_vm1, %v1995_v15 }
 0x525   :  { %1681 = vmatprep.subr.bf16.mxu0 %v1995_v15 }
 0x533   :  { %v741_v53 = vpop.xlane.xlu0 %740 }
 0x534   :  { %1796 = vrcp.f32 %v741_v53 }
 0x537   :  { %v975_v5 = vpop.permute.xlu0 %974 }
 0x538   :  { %v980_v8 = vsel %vm786_vm3, %v975_v5, 0 }
 0x541   :  { %v1797_v56 = vpop.eup %1796 }
 0x542   :  { %v767_v4 = vmul.f32 %v1797_v56, %v2260_v26 }
 0x544   :  { %v775_v6 = vpack.c.bf16 %v767_v4, %v767_v4 }
 0x545   :  { %v744_v7 = vpop.xlane.xlu1 %743 }
 0x546   :  { %1798 = vrcp.f32 %v744_v7  ;;  %1666 = vmatmul.mubr.msk.bf16.vlgmr.msra.gmra.mxu1 %vm270_vm2, %v775_v6 }
 0x547   :  { %1676 = vmatpush3.bf16.msra.mxu1 %v980_v8  ;;  %1677 = vmatprep.mubr.msk.bf16.mxu1 %vm1996_vm1, %v1995_v15 }
 0x548   :  { %1687 = vmatprep.subr.bf16.mxu1 %v1995_v15 }
 0x549   :  { %v750_v9 = vpop.xlane.xlu1 %749 }
 0x54a   :  { %1800 = vrcp.f32 %v750_v9 }
 0x553   :  { %v1799_v10 = vpop.eup %1798 }
 0x554   :  { %v768_v42 = vmul.f32 %v1799_v10, %v2267_v29 }
 0x556   :  { %v776_v44 = vpack.c.bf16 %v768_v42, %v768_v42 }
 0x557   :  { %v1801_v38 = vpop.eup %1800 }
 0x558   :  { %1672 = vmatmul.mubr.msk.bf16.vlgmr.msra.gmra.mxu0 %vm270_vm2, %v776_v44  ;;  %v770_v12 = vmul.f32 %v1801_v38, %v2271_v31 }
 0x559   :  { %1682 = vmatpush3.bf16.msra.mxu0 %v1028_v11  ;;  %1683 = vmatprep.mubr.msk.bf16.mxu0 %vm1996_vm1, %v1995_v15 }
 0x55a   :  { %1693 = vmatprep.subr.bf16.mxu0 %v1995_v15  ;;  %v778_v13 = vpack.c.bf16 %v770_v12, %v770_v12 }
 0x560   :  { %1684 = vmatmul.mubr.msk.bf16.vlgmr.msra.gmra.mxu0 %vm270_vm2, %v778_v13 }
 0x561   :  { %1695 = vmatprep.mubr.msk.bf16.mxu0 %vm1996_vm1, %v1995_v15 }
 0x568   :  { %v747_v14 = vpop.xlane.xlu0 %746 }
 0x569   :  { %1802 = vrcp.f32 %v747_v14 }
 0x56c   :  { %v753_v16 = vpop.xlane.xlu0 %752 }
 0x56d   :  { %1804 = vrcp.f32 %v753_v16 }
 0x570   :  { %v1071_v18 = vpop.permute.xlu0 %1070 }
 0x571   :  { %v1076_v22 = vsel %vm786_vm3, %v1071_v18, 0 }
 0x576   :  { %v1803_v17 = vpop.eup %1802 }
 0x577   :  { %v769_v47 = vmul.f32 %v1803_v17, %v2279_v40 }
 0x578   :  { %v756_v19 = vpop.xlane.xlu1 %755 }
 0x579   :  { %1806 = vrcp.f32 %v756_v19  ;;  %v777_v20 = vpack.c.bf16 %v769_v47, %v769_v47 }
 0x57a   :  { %v1805_v21 = vpop.eup %1804 }
 0x57b   :  { %1678 = vmatmul.mubr.msk.bf16.vlgmr.msra.gmra.mxu1 %vm270_vm2, %v777_v20  ;;  %v771_v26 = vmul.f32 %v1805_v21, %v2283_v48 }
 0x57c   :  { %1688 = vmatpush3.bf16.msra.mxu1 %v1076_v22  ;;  %v1119_v23 = vpop.permute.xlu1 %1118  ;;  %1689 = vmatprep.mubr.msk.bf16.mxu1 %vm1996_vm1, %v1995_v15  ;;  %v1531_v22 = vld [vmem:[#allocation7] ss:$0 sm:$0xff] }
 0x57d   :  { %v1124_v24 = vsel %vm786_vm3, %v1119_v23, 0  ;;  %1699 = vmatprep.subr.bf16.mxu1 %v1995_v15  ;;  %v779_v54 = vpack.c.bf16 %v771_v26, %v771_v26 }
 0x57e   :  { %1694 = vmatpush3.bf16.msra.mxu0 %v1124_v24 }
 0x57f   :  { %1707 = vmatprep.subr.bf16.mxu0 %v1995_v15 }
 0x583   :  { %1690 = vmatmul.mubr.msk.bf16.vlgmr.msra.gmra.mxu1 %vm270_vm2, %v779_v54 }
 0x584   :  { %1703 = vmatprep.mubr.msk.bf16.mxu1 %vm1996_vm1, %v1995_v15  ;;  %1700 = vmatpush3.bf16.msra.mxu1 %v1764_v57  ;;  %v1535_v57 = vld [vmem:[#allocation11] ss:$0 sm:$0xff] }
 0x585   :  { %1701 = vmatprep.subr.bf16.mxu1 %v1995_v15 }
 0x586   :  { %v1807_v25 = vpop.eup %1806 }
 0x587   :  { %v772_v27 = vmul.f32 %v1807_v25, %v2288_v55 }
 0x588   :  { %1702 = vmatpush3.bf16.msra.mxu1 %v1765_v63 }
 0x589   :  { %v780_v28 = vpack.c.bf16 %v772_v27, %v772_v27  ;;  %1715 = vmatprep.subr.bf16.mxu1 %v1995_v15 }
 0x58b   :  { %1696 = vmatmul.mubr.msk.bf16.vlgmr.msra.gmra.mxu0 %vm270_vm2, %v780_v28 }
 0x58c   :  { %1711 = vmatprep.mubr.msk.bf16.mxu0 %vm1996_vm1, %v1995_v15 }
 0x5ae   :  { %v824_v29 = vpop.f32.mrf.mxu1 }
 0x5b0   :  { %v1655_v30 = vpop.f32.mrf.mxu1 }
 0x5b2   :  { %v827_v31 = vpop.f32.mrf.mxu1 }
 0x5b4   :  { %v1656_v32 = vpop.f32.mrf.mxu1 }
 0x5e3   :  { %v872_v33 = vpop.f32.mrf.mxu0 }
 0x5e5   :  { %v1661_v34 = vpop.f32.mrf.mxu0 }
 0x5e7   :  { %v875_v35 = vpop.f32.mrf.mxu0 }
 0x5e9   :  { %v1662_v37 = vpop.f32.mrf.mxu0 }
 0x606   :  { %v920_v39 = vpop.f32.mrf.mxu1 }
 0x608   :  { %v1667_v40 = vpop.f32.mrf.mxu1 }
 0x60a   :  { %v923_v41 = vpop.f32.mrf.mxu1 }
 0x60c   :  { %v1668_v43 = vpop.f32.mrf.mxu1 }
 0x60d   :  { %v1766_v43 = vld [vmem:[%s2415_s10 + $0x8] sm:$0xff]  }
 0x60e   :  { %1708 = vmatpush3.bf16.msra.mxu0 %v1766_v43 }
 0x60f   :  { %1709 = vmatprep.subr.bf16.mxu0 %v1995_v15 }
 0x618   :  { %v968_v45 = vpop.f32.mrf.mxu0 }
 0x619   :  { %v1747_v46 = vpack.i.bf16 %v968_v45, %v920_v39  ;;  %v1767_v45 = vld [vmem:[%s2415_s10] sm:$0xff]  }
 0x61a   :  { %v1673_v50 = vpop.f32.mrf.mxu0  ;;  %1710 = vmatpush3.bf16.msra.mxu0 %v1767_v45 }
 0x61b   :  { %1748 = vrot.lane.b32.xlu0 %v1747_v46, %s2002_s26 }
 0x61c   :  { %v971_v48 = vpop.f32.mrf.mxu0 }
 0x61e   :  { %v1674_v36 = vpop.f32.mrf.mxu0 }
 0x620   :  { %v1064_v49 = vpop.f32.mrf.mxu0 }
 0x622   :  { %v1685_v51 = vpop.f32.mrf.mxu0 }
 0x624   :  { %v1067_v52 = vpop.f32.mrf.mxu0 }
 0x626   :  { %v1686_v55 = vpop.f32.mrf.mxu0 }
 0x63b   :  { %v1016_v58 = vpop.f32.mrf.mxu1 }
 0x63c   :  { %v1752_v59 = vpack.i.bf16 %v1064_v49, %v1016_v58 }
 0x63d   :  { %v1679_v60 = vpop.f32.mrf.mxu1 }
 0x63e   :  { %1753 = vrot.lane.b32.xlu1 %v1752_v59, %s1990_s6 }
 0x63f   :  { %v1019_v61 = vpop.f32.mrf.mxu1 }
 0x640   :  { %v1536_v61 = vld [vmem:[#allocation13] ss:$0 sm:$0xff] }
 0x641   :  { %v1680_v62 = vpop.f32.mrf.mxu1 }
 0x643   :  { %v1112_v2 = vpop.f32.mrf.mxu1 }
 0x645   :  { %v1691_v53 = vpop.f32.mrf.mxu1 }
 0x647   :  { %v1115_v56 = vpop.f32.mrf.mxu1 }
 0x648   :  { %v1768_v56 = vld [vmem:[%s2417_s12 + $0x18] sm:$0xff]  }
 0x649   :  { %v1692_v3 = vpop.f32.mrf.mxu1 }
 0x64a   :  { %v1769_v3 = vld [vmem:[%s2417_s12 + $0x10] sm:$0xff]  }
 0x64b   :  { %v1160_v4 = vpop.f32.mrf.mxu0 }
 0x64c   :  { %v1757_v5 = vpack.i.bf16 %v1160_v4, %v1112_v2  ;;  %v1770_v4 = vld [vmem:[%s2417_s12 + $0x8] sm:$0xff]  }
 0x64d   :  { %v1697_v6 = vpop.f32.mrf.mxu0 }
 0x64e   :  { %1758 = vrot.lane.b32.xlu0 %v1757_v5, %s2003_s3  ;;  %v1771_v5 = vld [vmem:[%s2417_s12] sm:$0xff]  }
 0x64f   :  { %v1163_v7 = vpop.f32.mrf.mxu0  ;;  %v1537_v6 = vld [vmem:[%s2416_s11] ss:$0 sm:$0xff] }
 0x651   :  { %v1698_v8 = vpop.f32.mrf.mxu0 }
 0x68d   :  { %v1749_v9 = vpop.permute.xlu0 %1748 }
 0x68e   :  { %v1751_v42 = vunpack.i.h.bf16 %v1749_v9  ;;  %v1750_v44 = vunpack.i.l.bf16 %v1749_v9 }
 0x690   :  { %v1191_v13 = vsel %vm270_vm2, %v872_v33, %v1751_v42  ;;  %v1190_v14 = vsel %vm270_vm2, %v824_v29, %v1750_v44 }
 0x6b0   :  { %v1754_v10 = vpop.permute.xlu1 %1753 }
 0x6b1   :  { %v1756_v38 = vunpack.i.h.bf16 %v1754_v10  ;;  %v1755_v11 = vunpack.i.l.bf16 %v1754_v10 }
 0x6b3   :  { %v1194_v47 = vsel %vm1192_vm4, %v1191_v13, %v1756_v38  ;;  %v1193_v18 = vsel %vm1192_vm4, %v1190_v14, %v1755_v11 }
 0x6c0   :  { %v1759_v12 = vpop.permute.xlu0 %1758 }
 0x6c1   :  { %v1761_v16 = vunpack.i.h.bf16 %v1759_v12  ;;  %v1760_v17 = vunpack.i.l.bf16 %v1759_v12 }
 0x6c3   :  { %v1197_v19 = vsel %vm1195_vm5, %v1194_v47, %v1761_v16  ;;  %v1196_v20 = vsel %vm1195_vm5, %v1193_v18, %v1760_v17 }
 0x6c4   :  { %v1198_v21 = vpack.c.bf16 %v1197_v19, %v1196_v20  ;;  %v1541_v20 = vld [vmem:[%s2418_s13] ss:$0 sm:$0xff] }
 0x6c6   :  { %1704 = vmatmul.mubr.msk.bf16.vlgmr.msra.gmra.mxu1 %vm138_vm0, %v1198_v21 }
 0x6c7   :  { %1723 = vmatprep.mubr.msk.bf16.mxu1 %vm1996_vm1, %v1995_v15  ;;  %1716 = vmatpush3.bf16.msra.mxu1 %v1768_v56 }
 0x6c8   :  { %1717 = vmatprep.subr.bf16.mxu1 %v1995_v15 }
 0x6cb   :  { %1718 = vmatpush3.bf16.msra.mxu1 %v1769_v3 }
 0x6cc   :  { %1719 = vmatprep.subr.bf16.mxu1 %v1995_v15 }
 0x6cf   :  { %1720 = vmatpush3.bf16.msra.mxu1 %v1770_v4 }
 0x6d0   :  { %1721 = vmatprep.subr.bf16.mxu1 %v1995_v15 }
 0x6d3   :  { %1722 = vmatpush3.bf16.msra.mxu1 %v1771_v5 }
 0x786   :  { %v1259_v23 = vpop.f32.mrf.mxu1 }
 0x787   :  { %v1260_v24 = vadd.f32 %v1531_v22, %v1259_v23 }
 0x788   :  { %v1705_v26 = vpop.f32.mrf.mxu1 }
 0x789   :  { %v2355_v54 = vadd.f32 %v1260_v24, %v2107_v0 }
 0x78a   :  { %v1262_v25 = vpop.f32.mrf.mxu1 }
 0x78b   :  { %v1263_v27 = vadd.f32 %v1531_v22, %v1262_v25  ;;  %v1270_v28 = vsel %vm138_vm0, %v2355_v54, 0.0 }
 0x78c   :  { %1271 = vadd.xlane.f32.xlu1 %v1270_v28  ;;  %v1706_v29 = vpop.f32.mrf.mxu1 }
 0x78d   :  { %v2360_v30 = vadd.f32 %v1263_v27, %v2112_v1 }
 0x78f   :  { %v1273_v31 = vsel %vm138_vm0, %v2360_v30, 0.0 }
 0x790   :  { %1274 = vadd.xlane.f32.xlu0 %v1273_v31 }
 0x815   :  { %v1272_v32 = vpop.xlane.xlu1 %1271 }
 0x816   :  { %v1276_v33 = vmul.f32 0.03125, %v1272_v32 }
 0x818   :  { %v1278_v34 = vsub.f32 %v2355_v54, %v1276_v33 }
 0x819   :  { %v1275_v0 = vpop.xlane.xlu0 %1274 }
 0x81a   :  { %v1277_v35 = vmul.f32 0.03125, %v1275_v0  ;;  %v1280_v37 = vmul.f32 %v1278_v34, %v1278_v34 }
 0x81c   :  { %v1279_v39 = vsub.f32 %v2360_v30, %v1277_v35  ;;  %v1282_v40 = vsel %vm138_vm0, %v1280_v37, 0.0 }
 0x81d   :  { %1283 = vadd.xlane.f32.xlu0 %v1282_v40 }
 0x81e   :  { %v1281_v41 = vmul.f32 %v1279_v39, %v1279_v39 }
 0x820   :  { %v1285_v1 = vsel %vm138_vm0, %v1281_v41, 0.0 }
 0x821   :  { %1286 = vadd.xlane.f32.xlu0 %v1285_v1 }
 0x8a6   :  { %v1284_v46 = vpop.xlane.xlu0 %1283 }
 0x8a7   :  { %v1288_v50 = vmul.f32 0.03125, %v1284_v46 }
 0x8a9   :  { %v1290_v48 = vadd.f32 1e-05, %v1288_v50 }
 0x8aa   :  { %v1287_v36 = vpop.xlane.xlu0 %1286 }
 0x8ab   :  { %1808 = vrsqrt.f32 %v1290_v48  ;;  %v1289_v49 = vmul.f32 0.03125, %v1287_v36 }
 0x8ad   :  { %v1291_v51 = vadd.f32 1e-05, %v1289_v49 }
 0x8af   :  { %1810 = vrsqrt.f32 %v1291_v51 }
 0x8b8   :  { %v1809_v52 = vpop.eup %1808 }
 0x8b9   :  { %v1294_v55 = vmul.f32 %v1809_v52, %v1278_v34 }
 0x8bb   :  { %v1302_v60 = vmul.f32 %v1535_v57, %v1294_v55 }
 0x8bc   :  { %v1811_v58 = vpop.eup %1810 }
 0x8bd   :  { %v1295_v59 = vmul.f32 %v1811_v58, %v1279_v39  ;;  %v1310_v63 = vadd.f32 %v1536_v61, %v1302_v60 }
 0x8bf   :  { %v1303_v62 = vmul.f32 %v1535_v57, %v1295_v59 }
 0x8c1   :  { %v1311_v2 = vadd.f32 %v1536_v61, %v1303_v62 }
 0x8c3   :  { %v1312_v53 = vpack.c.bf16 %v1311_v2, %v1310_v63 }
 0x8c5   :  { %1712 = vmatmul.mubr.msk.bf16.vlgmr.msra.gmra.mxu0 %vm138_vm0, %v1312_v53 }
 0x985   :  { %v1373_v7 = vpop.f32.mrf.mxu0 }
 0x986   :  { %v1374_v8 = vadd.f32 %v1537_v6, %v1373_v7 }
 0x987   :  { %v1713_v9 = vpop.f32.mrf.mxu0 }
 0x988   :  { %v1382_v10 = vmul.f32 0.70710677, %v1374_v8  ;;  %v1380_v14 = vmul.f32 0.5, %v1374_v8 }
 0x989   :  { %v1376_v42 = vpop.f32.mrf.mxu0 }
 0x98a   :  { %1812 = verf.f32 %v1382_v10  ;;  %v1377_v44 = vadd.f32 %v1537_v6, %v1376_v42 }
 0x98b   :  { %v1714_v38 = vpop.f32.mrf.mxu0 }
 0x98c   :  { %v1383_v11 = vmul.f32 0.70710677, %v1377_v44  ;;  %v1381_v16 = vmul.f32 0.5, %v1377_v44 }
 0x98e   :  { %1814 = verf.f32 %v1383_v11 }
 0x997   :  { %v1813_v15 = vpop.eup %1812 }
 0x998   :  { %v1386_v12 = vadd.f32 1.0, %v1813_v15 }
 0x99a   :  { %v1388_v47 = vmul.f32 %v1386_v12, %v1380_v14 }
 0x99b   :  { %v1815_v13 = vpop.eup %1814 }
 0x99c   :  { %v1387_v17 = vadd.f32 1.0, %v1815_v13 }
 0x99e   :  { %v1389_v18 = vmul.f32 %v1387_v17, %v1381_v16 }
 0x9a0   :  { %v1390_v19 = vpack.c.bf16 %v1389_v18, %v1388_v47 }
 0x9a2   :  { %1724 = vmatmul.mubr.msk.bf16.vlgmr.msra.gmra.mxu1 %vm1430_vm6, %v1390_v19 }
 0xa62   :  { %v1468_v21 = vpop.f32.mrf.mxu1 }
 0xa63   :  { %v1469_v22 = vadd.f32 %v1541_v20, %v1468_v21 }
 0xa64   :  { %v1725_v23 = vpop.f32.mrf.mxu1 }
 0xa65   :  { %v1475_v24 = vadd.f32 %v1469_v22, %v2355_v54 }
 0xa66   :  { %v1471_v26 = vpop.f32.mrf.mxu1 }
 0xa67   :  { %1477 = vst.msk [vmem:[#allocation14] sm:$0xff] %vm138_vm0, %v1475_v24  ;;  %v1472_v25 = vadd.f32 %v1541_v20, %v1471_v26 }
 0xa68   :  { %v1726_v27 = vpop.f32.mrf.mxu1 }
 0xa69   :  { %v1476_v28 = vadd.f32 %v1472_v25, %v2360_v30 }
 0xa6b   :  { %1478 = vst.msk [vmem:[#allocation14 + $0x8] sm:$0xff] %vm138_vm0, %v1476_v28 }
 0xa6c   :  { %1967 = shalt.err (!%p1964_p11)
}
 0xa6d   :  { %s2005_s13 = smov 128  }
 0xa6e   :  { %1490 = dma.vmem_to_hbm [thread:$0]  %s1485_s22, 256, %s2419_s14, [#allocation4], %s2005_s13, %s2005_s13, %s2002_s26  }
 0xa6f   :  { %1984 = dma.done.wait [#allocation4], 256  }
 0xa70   :  { %1985 = vsyncadd [#allocation4], 4294967040 }
 0xa71   :  { %1494 = vsyncpa [#allocation3], 1 }
 0xa72   :  { %1495 = vsyncpa [#allocation6], 1 }
 0xa73   :  { %1496 = vsyncpa [#allocation9], 1 }
 0xa74   :  { %1497 = vsyncpa [#allocation12], 1 }
 0xa75   :  { %1498 = vsyncpa [#allocation4], 1 }

</bundles_post_ra>
